<compile_context>
chip_gen: v6e
topology: v6e:2x2x1
jax: 0.10.0
libtpu: 0.0.40
codegen_flags: <defaults>
</compile_context>

<pallas_src>
import jax
import jax.numpy as jnp
from jax.experimental import pallas as pl
from jax.experimental.pallas import tpu as pltpu


def _fc_head_kernel(x_ref, w1_ref, b1_ref, w2_ref, b2_ref, w3_ref, b3_ref, o_ref):
    # x_ref block: (tm, D) backbone features for one row tile (bf16 stream).
    x = x_ref[...].astype(jnp.bfloat16)                       # no-op when already bf16
    h = jnp.dot(x, w1_ref[...], preferred_element_type=jnp.float32)
    h = jnp.maximum(h + b1_ref[...], 0.0)                     # Linear(2048,256)+ReLU
    # NOTE(v5e): if VALU ever binds, keep h in f32 here (bf16 pack is emulated
    # on v5e); on v6e/v7x this is moot and the kernel is DMA-bound anyway.
    h = jnp.dot(h.astype(jnp.bfloat16), w2_ref[...],
                preferred_element_type=jnp.float32)
    h = jnp.maximum(h + b2_ref[...], 0.0)                     # Linear(256,256)+ReLU
    o = jnp.dot(h.astype(jnp.bfloat16), w3_ref[...],
                preferred_element_type=jnp.float32)
    o_ref[...] = (o + b3_ref[...]).astype(o_ref.dtype)        # Linear(256,E_pad), bf16 out


def _round_up(x, m):
    return ((x + m - 1) // m) * m


def _pick_row_tile(B):
    """Largest (8,.)-aligned row tile <= 512, preferring >= 2 grid steps (v7x)."""
    b8 = _round_up(B, 8)
    if b8 <= 8:
        return 8, 8                                  # tiny batch: one 8-row tile
    tm = min(512, _round_up(pl.cdiv(b8, 2), 8))      # >= 2 tiles -> both v7x TCs busy
    return tm, _round_up(b8, tm)


def resnet_embedding_forward(backbone_feats, params):
    """ResNetEmbedding.forward on pre-extracted backbone features.

    backbone_feats: (B, 2048, 1, 1) or (B, 2048) — output of the frozen trunk
    (ideally bf16, streamed as-is; f32 also accepted and cast in-register).
    Returns the (B, embedding_size) embedding in bfloat16.
    """
    w1, b1, w2, b2, w3, b3 = params
    B = backbone_feats.shape[0]
    x = backbone_feats.reshape(B, -1)          # forward_once's .view(B, -1): free reshape
    D = x.shape[1]
    H1, H2, E = w1.shape[1], w2.shape[1], w3.shape[1]

    # Lane-dense output: pad embedding dim up to a 128-lane multiple (unmasked vst).
    E_pad = _round_up(E, 128)
    if E_pad != E:
        w3p = jnp.zeros((H2, E_pad), w3.dtype).at[:, :E].set(w3)
        b3p = jnp.zeros((E_pad,), b3.dtype).at[:E].set(b3)
    else:
        w3p, b3p = w3, b3

    # Row tiling of the batch (pad B to a tile multiple; padded rows sliced off).
    tm, B_pad = _pick_row_tile(B)
    if B_pad != B:
        x = jnp.zeros((B_pad, D), x.dtype).at[:B, :].set(x)
    grid = (B_pad // tm,)

    bytes_accessed = int(
        x.size * x.dtype.itemsize
        + sum(int(a.size) * a.dtype.itemsize for a in (w1, b1, w2, b2, w3p, b3p))
        + B_pad * E_pad * 2)
    flops = 2 * B_pad * (D * H1 + H1 * H2 + H2 * E_pad)

    out = pl.pallas_call(
        _fc_head_kernel,
        out_shape=jax.ShapeDtypeStruct((B_pad, E_pad), jnp.bfloat16),
        grid_spec=pltpu.PrefetchScalarGridSpec(
            num_scalar_prefetch=0,
            grid=grid,
            in_specs=[
                pl.BlockSpec((tm, D), lambda i: (i, 0)),      # activations (row-tiled)
                pl.BlockSpec((D, H1), lambda i: (0, 0)),      # W1 (resident, bf16)
                pl.BlockSpec((1, H1), lambda i: (0, 0)),      # b1 (f32)
                pl.BlockSpec((H1, H2), lambda i: (0, 0)),     # W2 (resident, bf16)
                pl.BlockSpec((1, H2), lambda i: (0, 0)),      # b2 (f32)
                pl.BlockSpec((H2, E_pad), lambda i: (0, 0)),  # W3 (padded lanes, bf16)
                pl.BlockSpec((1, E_pad), lambda i: (0, 0)),   # b3 (f32)
            ],
            out_specs=pl.BlockSpec((tm, E_pad), lambda i: (i, 0)),
        ),
        compiler_params=pltpu.CompilerParams(
            dimension_semantics=("parallel",),
            vmem_limit_bytes=32 << 20),   # safe on v5e (16 MiB default) & v7x (64 MiB phys)
        cost_estimate=pl.CostEstimate(
            flops=flops, transcendentals=0, bytes_accessed=bytes_accessed),
    )(x, w1, b1.reshape(1, H1), w2, b2.reshape(1, H2), w3p, b3p.reshape(1, E_pad))

    return out[:B, :E]


def init_params(key, D, H, E):
    """fc head parameters; weights stored in bf16 (streamed/resident), biases f32."""
    ks = jax.random.split(key, 6)
    w1 = (jax.random.normal(ks[0], (D, H), jnp.float32) * 0.02).astype(jnp.bfloat16)
    b1 = jax.random.normal(ks[1], (H,), jnp.float32) * 0.01
    w2 = (jax.random.normal(ks[2], (H, H), jnp.float32) * 0.02).astype(jnp.bfloat16)
    b2 = jax.random.normal(ks[3], (H,), jnp.float32) * 0.01
    w3 = (jax.random.normal(ks[4], (H, E), jnp.float32) * 0.02).astype(jnp.bfloat16)
    b3 = jax.random.normal(ks[5], (E,), jnp.float32) * 0.01
    return w1, b1, w2, b2, w3, b3


def _reference(backbone_feats, params):
    """Pure-JAX reference using the same bf16 weights / f32 accumulation."""
    w1, b1, w2, b2, w3, b3 = params
    x = backbone_feats.reshape(backbone_feats.shape[0], -1).astype(jnp.bfloat16)
    h = jnp.maximum(jnp.dot(x, w1, preferred_element_type=jnp.float32) + b1, 0.0)
    h = jnp.maximum(jnp.dot(h.astype(jnp.bfloat16), w2,
                            preferred_element_type=jnp.float32) + b2, 0.0)
    o = jnp.dot(h.astype(jnp.bfloat16), w3, preferred_element_type=jnp.float32) + b3
    return o.astype(jnp.bfloat16)


if __name__ == "__main__":
    key = jax.random.PRNGKey(0)
    B = 2
    D = 2048        # ResNet-50 fc.in_features
    H = 256         # hidden width of the fc head
    E = 2           # embedding_size (module default)

    kx, kp = jax.random.split(key)
    # Stand-in for the frozen trunk's pooled output (B, 2048, 1, 1), produced
    # directly in bf16 so the kernel streams half the activation bytes.
    backbone_feats = jax.random.normal(kx, (B, D, 1, 1), jnp.float32).astype(jnp.bfloat16)
    params = init_params(kp, D, H, E)

    out = resnet_embedding_forward(backbone_feats, params)
    jax.block_until_ready(out)

    ref = _reference(backbone_feats, params)
    assert out.shape == (B, E)
    assert jnp.allclose(out.astype(jnp.float32), ref.astype(jnp.float32),
                        atol=2e-2, rtol=2e-2), \
        float(jnp.max(jnp.abs(out.astype(jnp.float32) - ref.astype(jnp.float32))))

    print("KERNEL_OK")
</pallas_src>

<mosaic_0001>
module attributes {stable_mosaic.version = 11 : i64} {
  func.func @_fc_head_kernel(%arg0: i32, %arg1: memref<8x2048xbf16, #tpu.memory_space<vmem>>, %arg2: memref<2048x256xbf16, #tpu.memory_space<vmem>>, %arg3: memref<1x256xf32, #tpu.memory_space<vmem>>, %arg4: memref<256x256xbf16, #tpu.memory_space<vmem>>, %arg5: memref<1x256xf32, #tpu.memory_space<vmem>>, %arg6: memref<256x128xbf16, #tpu.memory_space<vmem>>, %arg7: memref<1x128xf32, #tpu.memory_space<vmem>>, %arg8: memref<8x128xbf16, #tpu.memory_space<vmem>>) attributes {dimension_semantics = [#tpu.dimension_semantics<parallel>], iteration_bounds = array<i64: 1>, scalar_prefetch = 0 : i64, scratch_operands = 0 : i64, tpu.core_type = #tpu.core_type<tc>, window_params = [{transform_indices = @transform_0, window_bounds = array<i64: 8, 2048>}, {pipeline_mode = #tpu.pipeline_mode<synchronous>, transform_indices = @transform_1, window_bounds = array<i64: 2048, 256>}, {pipeline_mode = #tpu.pipeline_mode<synchronous>, transform_indices = @transform_2, window_bounds = array<i64: 1, 256>}, {pipeline_mode = #tpu.pipeline_mode<synchronous>, transform_indices = @transform_3, window_bounds = array<i64: 256, 256>}, {pipeline_mode = #tpu.pipeline_mode<synchronous>, transform_indices = @transform_4, window_bounds = array<i64: 1, 256>}, {pipeline_mode = #tpu.pipeline_mode<synchronous>, transform_indices = @transform_5, window_bounds = array<i64: 256, 128>}, {pipeline_mode = #tpu.pipeline_mode<synchronous>, transform_indices = @transform_6, window_bounds = array<i64: 1, 128>}, {transform_indices = @transform_7, window_bounds = array<i64: 8, 128>}]} {
    %c0 = arith.constant 0 : index
    %c0_0 = arith.constant 0 : index
    %0 = vector.load %arg1[%c0, %c0_0] : memref<8x2048xbf16, #tpu.memory_space<vmem>>, vector<8x2048xbf16>
    %c0_1 = arith.constant 0 : index
    %c0_2 = arith.constant 0 : index
    %1 = vector.load %arg2[%c0_1, %c0_2] : memref<2048x256xbf16, #tpu.memory_space<vmem>>, vector<2048x256xbf16>
    %cst = arith.constant dense<0.000000e+00> : vector<8x256xf32>
    %2 = tpu.matmul %0, %1, %cst {dimension_numbers = #tpu.dot_dimension_numbers<[1], [0], [0], [1], [0, 0, 1, 1], [], []>} : vector<8x2048xbf16>, vector<2048x256xbf16>, vector<8x256xf32> -> vector<8x256xf32>
    %c0_3 = arith.constant 0 : index
    %c0_4 = arith.constant 0 : index
    %3 = vector.load %arg3[%c0_3, %c0_4] : memref<1x256xf32, #tpu.memory_space<vmem>>, vector<1x256xf32>
    %4 = vector.broadcast %3 : vector<1x256xf32> to vector<8x256xf32>
    %5 = arith.addf %2, %4 : vector<8x256xf32>
    %cst_5 = arith.constant 0.000000e+00 : f32
    %6 = vector.broadcast %cst_5 : f32 to vector<8x256xf32>
    %7 = arith.maximumf %5, %6 : vector<8x256xf32>
    %8 = arith.truncf %7 : vector<8x256xf32> to vector<8x256xbf16>
    %c0_6 = arith.constant 0 : index
    %c0_7 = arith.constant 0 : index
    %9 = vector.load %arg4[%c0_6, %c0_7] : memref<256x256xbf16, #tpu.memory_space<vmem>>, vector<256x256xbf16>
    %cst_8 = arith.constant dense<0.000000e+00> : vector<8x256xf32>
    %10 = tpu.matmul %8, %9, %cst_8 {dimension_numbers = #tpu.dot_dimension_numbers<[1], [0], [0], [1], [0, 0, 1, 1], [], []>} : vector<8x256xbf16>, vector<256x256xbf16>, vector<8x256xf32> -> vector<8x256xf32>
    %c0_9 = arith.constant 0 : index
    %c0_10 = arith.constant 0 : index
    %11 = vector.load %arg5[%c0_9, %c0_10] : memref<1x256xf32, #tpu.memory_space<vmem>>, vector<1x256xf32>
    %12 = vector.broadcast %11 : vector<1x256xf32> to vector<8x256xf32>
    %13 = arith.addf %10, %12 : vector<8x256xf32>
    %cst_11 = arith.constant 0.000000e+00 : f32
    %14 = vector.broadcast %cst_11 : f32 to vector<8x256xf32>
    %15 = arith.maximumf %13, %14 : vector<8x256xf32>
    %16 = arith.truncf %15 : vector<8x256xf32> to vector<8x256xbf16>
    %c0_12 = arith.constant 0 : index
    %c0_13 = arith.constant 0 : index
    %17 = vector.load %arg6[%c0_12, %c0_13] : memref<256x128xbf16, #tpu.memory_space<vmem>>, vector<256x128xbf16>
    %cst_14 = arith.constant dense<0.000000e+00> : vector<8x128xf32>
    %18 = tpu.matmul %16, %17, %cst_14 {dimension_numbers = #tpu.dot_dimension_numbers<[1], [0], [0], [1], [0, 0, 1, 1], [], []>} : vector<8x256xbf16>, vector<256x128xbf16>, vector<8x128xf32> -> vector<8x128xf32>
    %c0_15 = arith.constant 0 : index
    %c0_16 = arith.constant 0 : index
    %19 = vector.load %arg7[%c0_15, %c0_16] : memref<1x128xf32, #tpu.memory_space<vmem>>, vector<1x128xf32>
    %20 = vector.broadcast %19 : vector<1x128xf32> to vector<8x128xf32>
    %21 = arith.addf %18, %20 : vector<8x128xf32>
    %22 = arith.truncf %21 : vector<8x128xf32> to vector<8x128xbf16>
    %c0_17 = arith.constant 0 : index
    %c0_18 = arith.constant 0 : index
    %23 = vector.load %arg8[%c0_17, %c0_18] : memref<8x128xbf16, #tpu.memory_space<vmem>>, vector<8x128xbf16>
    tpu.vector_store %arg8[%c0_17, %c0_18], %22 {strides = array<i32>} : memref<8x128xbf16, #tpu.memory_space<vmem>>, vector<8x128xbf16>,
    return
  }
  func.func @transform_0(%arg0: i32) -> (i32, i32) {
    %c0_i32 = arith.constant 0 : i32
    %c0_i32_0 = arith.constant 0 : i32
    return %arg0, %c0_i32 : i32, i32
  }
  func.func @transform_1(%arg0: i32) -> (i32, i32) {
    %c0_i32 = arith.constant 0 : i32
    %c0_i32_0 = arith.constant 0 : i32
    %c0_i32_1 = arith.constant 0 : i32
    return %c0_i32, %c0_i32_0 : i32, i32
  }
  func.func @transform_2(%arg0: i32) -> (i32, i32) {
    %c0_i32 = arith.constant 0 : i32
    %c0_i32_0 = arith.constant 0 : i32
    %c0_i32_1 = arith.constant 0 : i32
    return %c0_i32, %c0_i32_0 : i32, i32
  }
  func.func @transform_3(%arg0: i32) -> (i32, i32) {
    %c0_i32 = arith.constant 0 : i32
    %c0_i32_0 = arith.constant 0 : i32
    %c0_i32_1 = arith.constant 0 : i32
    return %c0_i32, %c0_i32_0 : i32, i32
  }
  func.func @transform_4(%arg0: i32) -> (i32, i32) {
    %c0_i32 = arith.constant 0 : i32
    %c0_i32_0 = arith.constant 0 : i32
    %c0_i32_1 = arith.constant 0 : i32
    return %c0_i32, %c0_i32_0 : i32, i32
  }
  func.func @transform_5(%arg0: i32) -> (i32, i32) {
    %c0_i32 = arith.constant 0 : i32
    %c0_i32_0 = arith.constant 0 : i32
    %c0_i32_1 = arith.constant 0 : i32
    return %c0_i32, %c0_i32_0 : i32, i32
  }
  func.func @transform_6(%arg0: i32) -> (i32, i32) {
    %c0_i32 = arith.constant 0 : i32
    %c0_i32_0 = arith.constant 0 : i32
    %c0_i32_1 = arith.constant 0 : i32
    return %c0_i32, %c0_i32_0 : i32, i32
  }
  func.func @transform_7(%arg0: i32) -> (i32, i32) {
    %c0_i32 = arith.constant 0 : i32
    %c0_i32_0 = arith.constant 0 : i32
    return %arg0, %c0_i32 : i32, i32
  }
}

</mosaic_0001>

<bundles_post_ra>
// kernel: tpu_custom_call.1
= control target key start
LH: loop header
LB: loop body
LE: loop exit
PB: predicated region body
PF: predicated region fallthrough
CT: control target
= control target key end

     0   :  { %12 = vsyncpa [#allocation3], 0  ;;  %s3519_s0 = inlined_call_operand.hbm [shape: bf16[8,2048], index: 0, kind: input, shape index: {}]   ;;  %s3520_s1 = inlined_call_operand.hbm [shape: bf16[2048,256], index: 1, kind: input, shape index: {}]   ;;  %s3521_s2 = inlined_call_operand.vmem [shape: f32[1,256], index: 2, kind: input, shape index: {}]   ;;  %s3522_s3 = inlined_call_operand.hbm [shape: bf16[256,256], index: 3, kind: input, shape index: {}]   ;;  %s3523_s4 = inlined_call_operand.vmem [shape: f32[1,256], index: 4, kind: input, shape index: {}]   ;;  %s3524_s5 = inlined_call_operand.hbm [shape: bf16[256,128], index: 5, kind: input, shape index: {}]   ;;  %s3525_s6 = inlined_call_operand.vmem [shape: f32[1,128], index: 6, kind: input, shape index: {}]   ;;  %s3526_s7 = inlined_call_operand.hbm [shape: bf16[8,128], index: 7, kind: output, shape index: {}]  }
   0x1   :  { %13 = vsyncpa [#allocation6], 0 }
   0x2   :  { %14 = vsyncpa [#allocation9], 0 }
   0x3   :  { %15 = vsyncpa [#allocation4], 0  ;;  %s3392_s24 = smov [#allocation5]  }
   0x4   :  { %s31_s25 = sshll.u32 %s3392_s24, 4  ;;  %s32_s25 = int_to_ptr.vmem [resolvable:$true] %s31_s25 }
   0x5   :  { %s3292_s26 = scalar_lea.vmem %s32_s25, 32768  ;;  %p3297_p1 = scmp.lt.s32.totalorder %s32_s25, %s32_s25 }
   0x6   :  { %p3293_p0 = scmp.ne.s32.totalorder %s32_s25, %s3292_s26  ;;  %p3298_p2 = scmp.lt.s32.totalorder %s3292_s26, %s3292_s26 }
   0x8   :  { %p3299_p3 = por %p3298_p2, %p3297_p1 }
   0xa   :  { %p3300_p4 = pnand %p3299_p3, %p3293_p0 }
   0xc   :  { %3303 = shalt.err (!%p3300_p4)
}
   0xd   :  { %s3393_s27 = smov 128   ;;  %s3394_s28 = smov 8  }
   0xe   :  { %37 = dma.hbm_to_vmem [thread:$0]  %s3520_s1, 32768, %s32_s25, [#allocation6], %s3393_s27, %s3393_s27, %s3394_s28  }
   0xf   :  { %s3395_s8 = smov [#allocation2]   ;;  %s3396_s10 = smov [#allocation7]  }
  0x10   :  { %s22_s9 = sshll.u32 %s3395_s8, 4  ;;  %s45_s11 = sshll.u32 %s3396_s10, 4  ;;  %s23_s9 = int_to_ptr.vmem [resolvable:$true] %s22_s9  ;;  %s46_s11 = int_to_ptr.vmem [resolvable:$true] %s45_s11 }
  0x11   :  { %s3312_s12 = scalar_lea.vmem %s23_s9, 1024  ;;  %p3317_p6 = scmp.lt.s32.totalorder %s23_s9, %s23_s9 }
  0x12   :  { %p3313_p5 = scmp.ne.s32.totalorder %s23_s9, %s3312_s12  ;;  %p3318_p7 = scmp.lt.s32.totalorder %s3312_s12, %s3312_s12 }
  0x14   :  { %p3319_p8 = por %p3318_p7, %p3317_p6 }
  0x16   :  { %p3320_p9 = pnand %p3319_p8, %p3313_p5 }
  0x18   :  { %3323 = shalt.err (!%p3320_p9)
}
  0x19   :  { %25 = dma.hbm_to_vmem [thread:$0]  %s3519_s0, 1024, %s23_s9, [#allocation3]  }
  0x1a   :  { %s3332_s15 = scalar_lea.vmem %s46_s11, 4096  ;;  %p3337_p11 = scmp.lt.s32.totalorder %s46_s11, %s46_s11 }
  0x1b   :  { %p3333_p10 = scmp.ne.s32.totalorder %s46_s11, %s3332_s15  ;;  %p3338_p12 = scmp.lt.s32.totalorder %s3332_s15, %s3332_s15 }
  0x1d   :  { %p3339_p13 = por %p3338_p12, %p3337_p11 }
  0x1f   :  { %p3340_p0 = pnand %p3339_p13, %p3333_p10 }
  0x21   :  { %3343 = shalt.err (!%p3340_p0)
}
  0x22   :  { %51 = dma.hbm_to_vmem [thread:$0]  %s3522_s3, 4096, %s46_s11, [#allocation6], %s3393_s27, %s3393_s27, %s3394_s28  }
  0x23   :  { %s3397_s17 = smov [#allocation8]  }
  0x24   :  { %s59_s18 = sshll.u32 %s3397_s17, 4  ;;  %s60_s18 = int_to_ptr.vmem [resolvable:$true] %s59_s18 }
  0x25   :  { %s3352_s19 = scalar_lea.vmem %s60_s18, 2048  ;;  %p3357_p2 = scmp.lt.s32.totalorder %s60_s18, %s60_s18 }
  0x26   :  { %p3353_p1 = scmp.ne.s32.totalorder %s60_s18, %s3352_s19  ;;  %p3358_p3 = scmp.lt.s32.totalorder %s3352_s19, %s3352_s19 }
  0x28   :  { %p3359_p4 = por %p3358_p3, %p3357_p2 }
  0x2a   :  { %p3360_p5 = pnand %p3359_p4, %p3353_p1 }
  0x2c   :  { %3363 = shalt.err (!%p3360_p5)
}
  0x2d   :  { %s3398_s0 = smov 64   ;;  %s3399_s20 = smov 4  }
  0x2e   :  { %65 = dma.hbm_to_vmem [thread:$0]  %s3524_s5, 2048, %s60_s18, [#allocation9], %s3398_s0, %s3398_s0, %s3399_s20  }
  0x2f   :  { %3384 = dma.done.wait [#allocation3], 1024  }
  0x30   :  { %3385 = vsyncadd [#allocation3], 4294966272 }
  0x31   :  { %3386 = dma.done.wait [#allocation6], 36864  }
  0x32   :  { %3387 = vsyncadd [#allocation6], 4294930432 }
  0x33   :  { %3388 = dma.done.wait [#allocation9], 2048  }
  0x34   :  { %3389 = vsyncadd [#allocation9], 4294965248  ;;  %v2820_v0 = vld [vmem:[#allocation5 + $0x74] ss:$8 sps:$4 sm:$0xff]   ;;  %v2824_v2 = vld [vmem:[#allocation5 + $0x70] ss:$8 sps:$4 sm:$0xff]  }
  0x35   :  { %v2822_v1 = vld [vmem:[#allocation5 + $0x174] ss:$8 sps:$4 sm:$0xff]   ;;  %1693 = vmatprep.subr.bf16.mxu0 %v2820_v0  ;;  %v2825_v3 = vld [vmem:[#allocation5 + $0x170] ss:$8 sps:$4 sm:$0xff]   ;;  %v2826_v4 = vld [vmem:[#allocation5 + $0x64] ss:$8 sps:$4 sm:$0xff]  }
  0x36   :  { %1734 = vmatprep.subr.bf16.mxu1 %v2822_v1  ;;  %1694 = vmatpush1.bf16.msra.mxu0 %v2824_v2  ;;  %v2828_v5 = vld [vmem:[#allocation5 + $0x164] ss:$8 sps:$4 sm:$0xff]   ;;  %v2830_v6 = vld [vmem:[#allocation5 + $0x60] ss:$8 sps:$4 sm:$0xff]   ;;  %v2832_v8 = vld [vmem:[#allocation5 + $0x54] ss:$8 sps:$4 sm:$0xff]  }
  0x37   :  { %1735 = vmatpush1.bf16.msra.mxu1 %v2825_v3  ;;  %1695 = vmatprep.subr.bf16.mxu0 %v2826_v4  ;;  %v2831_v7 = vld [vmem:[#allocation5 + $0x160] ss:$8 sps:$4 sm:$0xff]   ;;  %v2834_v9 = vld [vmem:[#allocation5 + $0x154] ss:$8 sps:$4 sm:$0xff]   ;;  %v2836_v10 = vld [vmem:[#allocation5 + $0x50] ss:$8 sps:$4 sm:$0xff]  }
  0x38   :  { %1736 = vmatprep.subr.bf16.mxu1 %v2828_v5  ;;  %v2837_v11 = vld [vmem:[#allocation5 + $0x150] ss:$8 sps:$4 sm:$0xff]   ;;  %v2838_v12 = vld [vmem:[#allocation5 + $0x44] ss:$8 sps:$4 sm:$0xff]   ;;  %v2842_v14 = vld [vmem:[#allocation5 + $0x40] ss:$8 sps:$4 sm:$0xff]  }
  0x39   :  { %v2840_v13 = vld [vmem:[#allocation5 + $0x144] ss:$8 sps:$4 sm:$0xff]   ;;  %v2843_v15 = vld [vmem:[#allocation5 + $0x140] ss:$8 sps:$4 sm:$0xff]   ;;  %v2844_v16 = vld [vmem:[#allocation5 + $0x34] ss:$8 sps:$4 sm:$0xff]  }
  0x3a   :  { %1696 = vmatpush1.bf16.msra.mxu0 %v2830_v6  ;;  %v2846_v17 = vld [vmem:[#allocation5 + $0x134] ss:$8 sps:$4 sm:$0xff]   ;;  %v2848_v18 = vld [vmem:[#allocation5 + $0x30] ss:$8 sps:$4 sm:$0xff]   ;;  %v2850_v20 = vld [vmem:[#allocation5 + $0x24] ss:$8 sps:$4 sm:$0xff]  }
  0x3b   :  { %1737 = vmatpush1.bf16.msra.mxu1 %v2831_v7  ;;  %1697 = vmatprep.subr.bf16.mxu0 %v2832_v8  ;;  %v2849_v19 = vld [vmem:[#allocation5 + $0x130] ss:$8 sps:$4 sm:$0xff]   ;;  %v2852_v21 = vld [vmem:[#allocation5 + $0x124] ss:$8 sps:$4 sm:$0xff]   ;;  %v2854_v22 = vld [vmem:[#allocation5 + $0x20] ss:$8 sps:$4 sm:$0xff]  }
  0x3c   :  { %1738 = vmatprep.subr.bf16.mxu1 %v2834_v9  ;;  %v2855_v23 = vld [vmem:[#allocation5 + $0x120] ss:$8 sps:$4 sm:$0xff]   ;;  %v2856_v24 = vld [vmem:[#allocation5 + $0x14] ss:$8 sps:$4 sm:$0xff]   ;;  %v2860_v26 = vld [vmem:[#allocation5 + $0x10] ss:$8 sps:$4 sm:$0xff]  }
  0x3d   :  { %v2858_v25 = vld [vmem:[#allocation5 + $0x114] ss:$8 sps:$4 sm:$0xff]   ;;  %v2861_v27 = vld [vmem:[#allocation5 + $0x110] ss:$8 sps:$4 sm:$0xff]   ;;  %v2862_v28 = vld [vmem:[#allocation5 + $0x4] ss:$8 sps:$4 sm:$0xff]  }
  0x3e   :  { %1698 = vmatpush1.bf16.msra.mxu0 %v2836_v10  ;;  %v2864_v29 = vld [vmem:[#allocation5 + $0x104] ss:$8 sps:$4 sm:$0xff]   ;;  %v2866_v30 = vld [vmem:[#allocation5] ss:$8 sps:$4 sm:$0xff]   ;;  %v2868_v32 = vld [vmem:[#allocation5 + $0xf4] ss:$8 sps:$4 sm:$0xff]  }
  0x3f   :  { %1739 = vmatpush1.bf16.msra.mxu1 %v2837_v11  ;;  %1699 = vmatprep.subr.bf16.mxu0 %v2838_v12  ;;  %v2867_v31 = vld [vmem:[#allocation5 + $0x100] ss:$8 sps:$4 sm:$0xff]   ;;  %v2870_v33 = vld [vmem:[#allocation5 + $0x1f4] ss:$8 sps:$4 sm:$0xff]   ;;  %v2872_v34 = vld [vmem:[#allocation5 + $0xf0] ss:$8 sps:$4 sm:$0xff]  }
  0x40   :  { %1740 = vmatprep.subr.bf16.mxu1 %v2840_v13  ;;  %v2873_v35 = vld [vmem:[#allocation5 + $0x1f0] ss:$8 sps:$4 sm:$0xff]   ;;  %v2874_v36 = vld [vmem:[#allocation5 + $0xe4] ss:$8 sps:$4 sm:$0xff]   ;;  %v2878_v38 = vld [vmem:[#allocation5 + $0xe0] ss:$8 sps:$4 sm:$0xff]  }
  0x41   :  { %v2876_v37 = vld [vmem:[#allocation5 + $0x1e4] ss:$8 sps:$4 sm:$0xff]   ;;  %v2879_v39 = vld [vmem:[#allocation5 + $0x1e0] ss:$8 sps:$4 sm:$0xff]   ;;  %v2880_v40 = vld [vmem:[#allocation5 + $0xd4] ss:$8 sps:$4 sm:$0xff]  }
  0x42   :  { %1700 = vmatpush1.bf16.msra.mxu0 %v2842_v14  ;;  %v2882_v41 = vld [vmem:[#allocation5 + $0x1d4] ss:$8 sps:$4 sm:$0xff]   ;;  %v2884_v42 = vld [vmem:[#allocation5 + $0xd0] ss:$8 sps:$4 sm:$0xff]   ;;  %v2886_v44 = vld [vmem:[#allocation5 + $0xc4] ss:$8 sps:$4 sm:$0xff]  }
  0x43   :  { %1741 = vmatpush1.bf16.msra.mxu1 %v2843_v15  ;;  %1701 = vmatprep.subr.bf16.mxu0 %v2844_v16  ;;  %v2885_v43 = vld [vmem:[#allocation5 + $0x1d0] ss:$8 sps:$4 sm:$0xff]   ;;  %v2888_v45 = vld [vmem:[#allocation5 + $0x1c4] ss:$8 sps:$4 sm:$0xff]   ;;  %v2890_v49 = vld [vmem:[#allocation5 + $0xc0] ss:$8 sps:$4 sm:$0xff]  }
  0x44   :  { %1742 = vmatprep.subr.bf16.mxu1 %v2846_v17  ;;  %v81_v46 = vld [vmem:[#allocation2] sm:$0xff]  ;;  %v82_v48 = vld [vmem:[#allocation2 + $0x8] sm:$0xff]  ;;  %v2892_v52 = vld [vmem:[#allocation5 + $0xb4] ss:$8 sps:$4 sm:$0xff]   ;;  %s3400_s25 = smov [#allocation10]  }
  0x45   :  { %v2469_v47 = vcombine.high %v81_v46, %v81_v46  ;;  %v2891_v50 = vld [vmem:[#allocation5 + $0x1c0] ss:$8 sps:$4 sm:$0xff]   ;;  %v2471_v51 = vcombine.high %v82_v48, %v82_v48  ;;  %v2894_v53 = vld [vmem:[#allocation5 + $0x1b4] ss:$8 sps:$4 sm:$0xff]   ;;  %v2896_v54 = vld [vmem:[#allocation5 + $0xb0] ss:$8 sps:$4 sm:$0xff]   ;;  %v2468_v6 = vcombine.low %v81_v46, %v81_v46  ;;  %v2470_v7 = vcombine.low %v82_v48, %v82_v48 }
  0x46   :  { %1702 = vmatpush1.bf16.msra.mxu0 %v2848_v18  ;;  %v2897_v55 = vld [vmem:[#allocation5 + $0x1b0] ss:$8 sps:$4 sm:$0xff]   ;;  %v2898_v56 = vld [vmem:[#allocation5 + $0xa4] ss:$8 sps:$4 sm:$0xff]   ;;  %v2902_v58 = vld [vmem:[#allocation5 + $0xa0] ss:$8 sps:$4 sm:$0xff]  }
  0x47   :  { %1743 = vmatpush1.bf16.msra.mxu1 %v2849_v19  ;;  %1703 = vmatprep.subr.bf16.mxu0 %v2850_v20  ;;  %v2900_v57 = vld [vmem:[#allocation5 + $0x1a4] ss:$8 sps:$4 sm:$0xff]   ;;  %v2903_v59 = vld [vmem:[#allocation5 + $0x1a0] ss:$8 sps:$4 sm:$0xff]   ;;  %v2904_v60 = vld [vmem:[#allocation5 + $0x94] ss:$8 sps:$4 sm:$0xff]  }
  0x48   :  { %1744 = vmatprep.subr.bf16.mxu1 %v2852_v21  ;;  %1725 = vmatprep.mubr.bf16.mxu0 %v2469_v47  ;;  %v2906_v61 = vld [vmem:[#allocation5 + $0x194] ss:$8 sps:$4 sm:$0xff]   ;;  %v2908_v62 = vld [vmem:[#allocation5 + $0x90] ss:$8 sps:$4 sm:$0xff]   ;;  %v2910_v0 = vld [vmem:[#allocation5 + $0x84] ss:$8 sps:$4 sm:$0xff]  }
  0x49   :  { %1766 = vmatprep.mubr.bf16.mxu1 %v2471_v51  ;;  %v2909_v63 = vld [vmem:[#allocation5 + $0x190] ss:$8 sps:$4 sm:$0xff]   ;;  %v2912_v1 = vld [vmem:[#allocation5 + $0x184] ss:$8 sps:$4 sm:$0xff]   ;;  %v2914_v2 = vld [vmem:[#allocation5 + $0x80] ss:$8 sps:$4 sm:$0xff]  }
  0x4a   :  { %1704 = vmatpush1.bf16.msra.mxu0 %v2854_v22  ;;  %v2915_v3 = vld [vmem:[#allocation5 + $0x180] ss:$8 sps:$4 sm:$0xff]   ;;  %v2922_v4 = vld [vmem:[#allocation5 + $0x274] ss:$8 sps:$4 sm:$0xff]   ;;  %v2920_v8 = vld [vmem:[#allocation5 + $0x270] ss:$8 sps:$4 sm:$0xff]  }
  0x4b   :  { %1745 = vmatpush1.bf16.msra.mxu1 %v2855_v23  ;;  %1705 = vmatprep.subr.bf16.mxu0 %v2856_v24  ;;  %v2925_v5 = vld [vmem:[#allocation5 + $0x374] ss:$8 sps:$4 sm:$0xff]   ;;  %v2923_v9 = vld [vmem:[#allocation5 + $0x370] ss:$8 sps:$4 sm:$0xff]   ;;  %v2928_v10 = vld [vmem:[#allocation5 + $0x264] ss:$8 sps:$4 sm:$0xff]  }
  0x4c   :  { %1746 = vmatprep.subr.bf16.mxu1 %v2858_v25  ;;  %v2931_v11 = vld [vmem:[#allocation5 + $0x364] ss:$8 sps:$4 sm:$0xff]   ;;  %v2926_v12 = vld [vmem:[#allocation5 + $0x260] ss:$8 sps:$4 sm:$0xff]   ;;  %v2934_v14 = vld [vmem:[#allocation5 + $0x254] ss:$8 sps:$4 sm:$0xff]  }
  0x4d   :  { %v2929_v13 = vld [vmem:[#allocation5 + $0x360] ss:$8 sps:$4 sm:$0xff]   ;;  %v2937_v15 = vld [vmem:[#allocation5 + $0x354] ss:$8 sps:$4 sm:$0xff]   ;;  %v2932_v16 = vld [vmem:[#allocation5 + $0x250] ss:$8 sps:$4 sm:$0xff]  }
  0x4e   :  { %1706 = vmatpush1.bf16.msra.mxu0 %v2860_v26  ;;  %v2935_v17 = vld [vmem:[#allocation5 + $0x350] ss:$8 sps:$4 sm:$0xff]   ;;  %v2940_v18 = vld [vmem:[#allocation5 + $0x244] ss:$8 sps:$4 sm:$0xff]   ;;  %v2938_v20 = vld [vmem:[#allocation5 + $0x240] ss:$8 sps:$4 sm:$0xff]  }
  0x4f   :  { %1747 = vmatpush1.bf16.msra.mxu1 %v2861_v27  ;;  %1707 = vmatprep.subr.bf16.mxu0 %v2862_v28  ;;  %v2943_v19 = vld [vmem:[#allocation5 + $0x344] ss:$8 sps:$4 sm:$0xff]   ;;  %v2941_v21 = vld [vmem:[#allocation5 + $0x340] ss:$8 sps:$4 sm:$0xff]   ;;  %v2946_v22 = vld [vmem:[#allocation5 + $0x234] ss:$8 sps:$4 sm:$0xff]  }
  0x50   :  { %1748 = vmatprep.subr.bf16.mxu1 %v2864_v29  ;;  %v2949_v23 = vld [vmem:[#allocation5 + $0x334] ss:$8 sps:$4 sm:$0xff]   ;;  %v2944_v24 = vld [vmem:[#allocation5 + $0x230] ss:$8 sps:$4 sm:$0xff]   ;;  %v2952_v26 = vld [vmem:[#allocation5 + $0x224] ss:$8 sps:$4 sm:$0xff]  }
  0x51   :  { %v2947_v25 = vld [vmem:[#allocation5 + $0x330] ss:$8 sps:$4 sm:$0xff]   ;;  %v2955_v27 = vld [vmem:[#allocation5 + $0x324] ss:$8 sps:$4 sm:$0xff]   ;;  %v2950_v28 = vld [vmem:[#allocation5 + $0x220] ss:$8 sps:$4 sm:$0xff]  }
  0x52   :  { %1708 = vmatpush1.bf16.msra.mxu0 %v2866_v30  ;;  %v2953_v29 = vld [vmem:[#allocation5 + $0x320] ss:$8 sps:$4 sm:$0xff]   ;;  %v2958_v30 = vld [vmem:[#allocation5 + $0x214] ss:$8 sps:$4 sm:$0xff]   ;;  %v2976_v46 = vld [vmem:[#allocation5 + $0x2e4] ss:$8 sps:$4 sm:$0xff]  }
  0x53   :  { %1749 = vmatpush1.bf16.msra.mxu1 %v2867_v31  ;;  %1709 = vmatprep.subr.bf16.mxu0 %v2868_v32  ;;  %v2961_v31 = vld [vmem:[#allocation5 + $0x314] ss:$8 sps:$4 sm:$0xff]   ;;  %v2979_v47 = vld [vmem:[#allocation5 + $0x3e4] ss:$8 sps:$4 sm:$0xff]   ;;  %v2974_v48 = vld [vmem:[#allocation5 + $0x2e0] ss:$8 sps:$4 sm:$0xff]  }
  0x54   :  { %1750 = vmatprep.subr.bf16.mxu1 %v2870_v33  ;;  %v3453_v32 = vld [vmem:[#allocation2 + $0x10] sm:$0xff]  ;;  %v3455_v33 = vld [vmem:[#allocation2 + $0x18] sm:$0xff]  ;;  %s2457_s26 = sshll.u32 %s3400_s25, 4  ;;  %s2458_s26 = int_to_ptr.vmem [resolvable:$true] %s2457_s26 }
  0x55   :  { %v2985_v51 = vld [vmem:[#allocation5 + $0x3d4] ss:$8 sps:$4 sm:$0xff]   ;;  %s3364_s27 = scalar_lea.vmem %s2458_s26, 64  ;;  %p3369_p7 = scmp.lt.s32.totalorder %s2458_s26, %s2458_s26 }
  0x56   :  { %1710 = vmatpush2.bf16.msra.mxu0 %v2872_v34  ;;  %v2956_v34 = vld [vmem:[#allocation5 + $0x210] ss:$8 sps:$4 sm:$0xff]   ;;  %p3365_p6 = scmp.ne.s32.totalorder %s2458_s26, %s3364_s27  ;;  %p3370_p8 = scmp.lt.s32.totalorder %s3364_s27, %s3364_s27 }
  0x57   :  { %1751 = vmatpush2.bf16.msra.mxu1 %v2873_v35  ;;  %1711 = vmatprep.subr.bf16.mxu0 %v2874_v36  ;;  %v2959_v35 = vld [vmem:[#allocation5 + $0x310] ss:$8 sps:$4 sm:$0xff]   ;;  %v2473_v36 = vcombine.high %v3453_v32, %v3453_v32 }
  0x58   :  { %1752 = vmatprep.subr.bf16.mxu1 %v2876_v37  ;;  %v2475_v37 = vcombine.high %v3455_v33, %v3455_v33  ;;  %p3371_p9 = por %p3370_p8, %p3369_p7 }
  0x5a   :  { %1712 = vmatpush2.bf16.msra.mxu0 %v2878_v38  ;;  %v2964_v38 = vld [vmem:[#allocation5 + $0x204] ss:$8 sps:$4 sm:$0xff]   ;;  %p3372_p10 = pnand %p3371_p9, %p3365_p6 }
  0x5b   :  { %1753 = vmatpush2.bf16.msra.mxu1 %v2879_v39  ;;  %1713 = vmatprep.subr.bf16.mxu0 %v2880_v40  ;;  %v2967_v39 = vld [vmem:[#allocation5 + $0x304] ss:$8 sps:$4 sm:$0xff]   ;;  %v2962_v40 = vld [vmem:[#allocation5 + $0x200] ss:$8 sps:$4 sm:$0xff]  }
  0x5c   :  { %1754 = vmatprep.subr.bf16.mxu1 %v2882_v41  ;;  %v2965_v41 = vld [vmem:[#allocation5 + $0x300] ss:$8 sps:$4 sm:$0xff]  }
  0x5e   :  { %1714 = vmatpush2.bf16.msra.mxu0 %v2884_v42  ;;  %v2970_v42 = vld [vmem:[#allocation5 + $0x2f4] ss:$8 sps:$4 sm:$0xff]  }
  0x5f   :  { %1755 = vmatpush2.bf16.msra.mxu1 %v2885_v43  ;;  %1715 = vmatprep.subr.bf16.mxu0 %v2886_v44  ;;  %v2973_v43 = vld [vmem:[#allocation5 + $0x3f4] ss:$8 sps:$4 sm:$0xff]   ;;  %v2968_v44 = vld [vmem:[#allocation5 + $0x2f0] ss:$8 sps:$4 sm:$0xff]  }
  0x60   :  { %1756 = vmatprep.subr.bf16.mxu1 %v2888_v45  ;;  %v2971_v45 = vld [vmem:[#allocation5 + $0x3f0] ss:$8 sps:$4 sm:$0xff]  }
  0x62   :  { %1716 = vmatpush2.bf16.msra.mxu0 %v2890_v49  ;;  %v2977_v49 = vld [vmem:[#allocation5 + $0x3e0] ss:$8 sps:$4 sm:$0xff]  }
  0x63   :  { %1757 = vmatpush2.bf16.msra.mxu1 %v2891_v50  ;;  %1717 = vmatprep.subr.bf16.mxu0 %v2892_v52  ;;  %v2982_v50 = vld [vmem:[#allocation5 + $0x2d4] ss:$8 sps:$4 sm:$0xff]   ;;  %v2980_v52 = vld [vmem:[#allocation5 + $0x2d0] ss:$8 sps:$4 sm:$0xff]  }
  0x64   :  { %1758 = vmatprep.subr.bf16.mxu1 %v2894_v53  ;;  %v2983_v53 = vld [vmem:[#allocation5 + $0x3d0] ss:$8 sps:$4 sm:$0xff]  }
  0x66   :  { %1718 = vmatpush2.bf16.msra.mxu0 %v2896_v54  ;;  %v2988_v54 = vld [vmem:[#allocation5 + $0x2c4] ss:$8 sps:$4 sm:$0xff]  }
  0x67   :  { %1759 = vmatpush2.bf16.msra.mxu1 %v2897_v55  ;;  %1719 = vmatprep.subr.bf16.mxu0 %v2898_v56  ;;  %v2991_v55 = vld [vmem:[#allocation5 + $0x3c4] ss:$8 sps:$4 sm:$0xff]   ;;  %v2986_v56 = vld [vmem:[#allocation5 + $0x2c0] ss:$8 sps:$4 sm:$0xff]  }
  0x68   :  { %1760 = vmatprep.subr.bf16.mxu1 %v2900_v57  ;;  %v2989_v57 = vld [vmem:[#allocation5 + $0x3c0] ss:$8 sps:$4 sm:$0xff]  }
  0x6a   :  { %1720 = vmatpush2.bf16.msra.mxu0 %v2902_v58  ;;  %v2994_v58 = vld [vmem:[#allocation5 + $0x2b4] ss:$8 sps:$4 sm:$0xff]  }
  0x6b   :  { %1761 = vmatpush2.bf16.msra.mxu1 %v2903_v59  ;;  %1721 = vmatprep.subr.bf16.mxu0 %v2904_v60  ;;  %v2997_v59 = vld [vmem:[#allocation5 + $0x3b4] ss:$8 sps:$4 sm:$0xff]   ;;  %v2992_v60 = vld [vmem:[#allocation5 + $0x2b0] ss:$8 sps:$4 sm:$0xff]  }
  0x6c   :  { %1762 = vmatprep.subr.bf16.mxu1 %v2906_v61  ;;  %v2995_v61 = vld [vmem:[#allocation5 + $0x3b0] ss:$8 sps:$4 sm:$0xff]  }
  0x6e   :  { %1722 = vmatpush2.bf16.msra.mxu0 %v2908_v62  ;;  %v3000_v62 = vld [vmem:[#allocation5 + $0x2a4] ss:$8 sps:$4 sm:$0xff]  }
  0x6f   :  { %1763 = vmatpush2.bf16.msra.mxu1 %v2909_v63  ;;  %1723 = vmatprep.subr.bf16.mxu0 %v2910_v0  ;;  %v3003_v63 = vld [vmem:[#allocation5 + $0x3a4] ss:$8 sps:$4 sm:$0xff]   ;;  %v2998_v0 = vld [vmem:[#allocation5 + $0x2a0] ss:$8 sps:$4 sm:$0xff]  }
  0x70   :  { %1764 = vmatprep.subr.bf16.mxu1 %v2912_v1  ;;  %v3001_v1 = vld [vmem:[#allocation5 + $0x3a0] ss:$8 sps:$4 sm:$0xff]  }
  0x72   :  { %1724 = vmatpush2.bf16.msra.mxu0 %v2914_v2  ;;  %v3006_v2 = vld [vmem:[#allocation5 + $0x294] ss:$8 sps:$4 sm:$0xff]  }
  0x73   :  { %1765 = vmatpush2.bf16.msra.mxu1 %v2915_v3  ;;  %1775 = vmatprep.subr.bf16.mxu0 %v2922_v4  ;;  %v3009_v3 = vld [vmem:[#allocation5 + $0x394] ss:$8 sps:$4 sm:$0xff]   ;;  %v3004_v4 = vld [vmem:[#allocation5 + $0x290] ss:$8 sps:$4 sm:$0xff]  }
  0x74   :  { %1816 = vmatprep.subr.bf16.mxu1 %v2925_v5  ;;  %v3007_v5 = vld [vmem:[#allocation5 + $0x390] ss:$8 sps:$4 sm:$0xff]  }
  0x75   :  { %1726 = vmatmul.mubr.bf16.vlgmr.msra.gmra.mxu0 %v2468_v6  ;;  %v3012_v6 = vld [vmem:[#allocation5 + $0x284] ss:$8 sps:$4 sm:$0xff]  }
  0x76   :  { %1767 = vmatmul.mubr.bf16.vlgmr.msra.gmra.mxu1 %v2470_v7  ;;  %1776 = vmatpush1.bf16.msra.mxu0 %v2920_v8  ;;  %v3015_v7 = vld [vmem:[#allocation5 + $0x384] ss:$8 sps:$4 sm:$0xff]   ;;  %v3010_v8 = vld [vmem:[#allocation5 + $0x280] ss:$8 sps:$4 sm:$0xff]  }
  0x77   :  { %1817 = vmatpush1.bf16.msra.mxu1 %v2923_v9  ;;  %1777 = vmatprep.subr.bf16.mxu0 %v2928_v10  ;;  %v3013_v9 = vld [vmem:[#allocation5 + $0x380] ss:$8 sps:$4 sm:$0xff]   ;;  %v3022_v10 = vld [vmem:[#allocation5 + $0x474] ss:$8 sps:$4 sm:$0xff]  }
  0x78   :  { %1818 = vmatprep.subr.bf16.mxu1 %v2931_v11  ;;  %1807 = vmatprep.mubr.bf16.mxu0 %v2473_v36  ;;  %v3025_v11 = vld [vmem:[#allocation5 + $0x574] ss:$8 sps:$4 sm:$0xff]   ;;  %v3052_v36 = vld [vmem:[#allocation5 + $0x424] ss:$8 sps:$4 sm:$0xff]  }
  0x79   :  { %1848 = vmatprep.mubr.bf16.mxu1 %v2475_v37  ;;  %v3055_v37 = vld [vmem:[#allocation5 + $0x524] ss:$8 sps:$4 sm:$0xff]  }
  0x7a   :  { %1778 = vmatpush1.bf16.msra.mxu0 %v2926_v12  ;;  %v2472_v12 = vcombine.low %v3453_v32, %v3453_v32  ;;  %v3046_v32 = vld [vmem:[#allocation5 + $0x434] ss:$8 sps:$4 sm:$0xff]  }
  0x7b   :  { %1819 = vmatpush1.bf16.msra.mxu1 %v2929_v13  ;;  %1779 = vmatprep.subr.bf16.mxu0 %v2934_v14  ;;  %v2474_v13 = vcombine.low %v3455_v33, %v3455_v33  ;;  %v3020_v14 = vld [vmem:[#allocation5 + $0x470] ss:$8 sps:$4 sm:$0xff]   ;;  %v3049_v33 = vld [vmem:[#allocation5 + $0x534] ss:$8 sps:$4 sm:$0xff]  }
  0x7c   :  { %1820 = vmatprep.subr.bf16.mxu1 %v2937_v15  ;;  %v3023_v15 = vld [vmem:[#allocation5 + $0x570] ss:$8 sps:$4 sm:$0xff]  }
  0x7e   :  { %1780 = vmatpush1.bf16.msra.mxu0 %v2932_v16  ;;  %v3028_v16 = vld [vmem:[#allocation5 + $0x464] ss:$8 sps:$4 sm:$0xff]  }
  0x7f   :  { %1821 = vmatpush1.bf16.msra.mxu1 %v2935_v17  ;;  %1781 = vmatprep.subr.bf16.mxu0 %v2940_v18  ;;  %v3031_v17 = vld [vmem:[#allocation5 + $0x564] ss:$8 sps:$4 sm:$0xff]  }
  0x80   :  { %1822 = vmatprep.subr.bf16.mxu1 %v2943_v19  ;;  %v3465_v18 = vld [vmem:[#allocation2 + $0x20] sm:$0xff]  ;;  %v3467_v19 = vld [vmem:[#allocation2 + $0x28] sm:$0xff] }
  0x82   :  { %1782 = vmatpush1.bf16.msra.mxu0 %v2938_v20  ;;  %v2477_v20 = vcombine.high %v3465_v18, %v3465_v18 }
  0x83   :  { %1823 = vmatpush1.bf16.msra.mxu1 %v2941_v21  ;;  %1783 = vmatprep.subr.bf16.mxu0 %v2946_v22  ;;  %v2479_v21 = vcombine.high %v3467_v19, %v3467_v19  ;;  %v3026_v22 = vld [vmem:[#allocation5 + $0x460] ss:$8 sps:$4 sm:$0xff]  }
  0x84   :  { %1824 = vmatprep.subr.bf16.mxu1 %v2949_v23  ;;  %v3029_v23 = vld [vmem:[#allocation5 + $0x560] ss:$8 sps:$4 sm:$0xff]  }
  0x86   :  { %1784 = vmatpush1.bf16.msra.mxu0 %v2944_v24  ;;  %v3034_v24 = vld [vmem:[#allocation5 + $0x454] ss:$8 sps:$4 sm:$0xff]  }
  0x87   :  { %1825 = vmatpush1.bf16.msra.mxu1 %v2947_v25  ;;  %1785 = vmatprep.subr.bf16.mxu0 %v2952_v26  ;;  %v3037_v25 = vld [vmem:[#allocation5 + $0x554] ss:$8 sps:$4 sm:$0xff]   ;;  %v3032_v26 = vld [vmem:[#allocation5 + $0x450] ss:$8 sps:$4 sm:$0xff]  }
  0x88   :  { %1826 = vmatprep.subr.bf16.mxu1 %v2955_v27  ;;  %v3035_v27 = vld [vmem:[#allocation5 + $0x550] ss:$8 sps:$4 sm:$0xff]  }
  0x8a   :  { %1786 = vmatpush1.bf16.msra.mxu0 %v2950_v28  ;;  %v3040_v28 = vld [vmem:[#allocation5 + $0x444] ss:$8 sps:$4 sm:$0xff]  }
  0x8b   :  { %1827 = vmatpush1.bf16.msra.mxu1 %v2953_v29  ;;  %1787 = vmatprep.subr.bf16.mxu0 %v2958_v30  ;;  %v3043_v29 = vld [vmem:[#allocation5 + $0x544] ss:$8 sps:$4 sm:$0xff]   ;;  %v3038_v30 = vld [vmem:[#allocation5 + $0x440] ss:$8 sps:$4 sm:$0xff]  }
  0x8c   :  { %1828 = vmatprep.subr.bf16.mxu1 %v2961_v31  ;;  %v3041_v31 = vld [vmem:[#allocation5 + $0x540] ss:$8 sps:$4 sm:$0xff]  }
  0x8e   :  { %1788 = vmatpush1.bf16.msra.mxu0 %v2956_v34  ;;  %v3044_v34 = vld [vmem:[#allocation5 + $0x430] ss:$8 sps:$4 sm:$0xff]  }
  0x8f   :  { %1829 = vmatpush1.bf16.msra.mxu1 %v2959_v35  ;;  %1789 = vmatprep.subr.bf16.mxu0 %v2964_v38  ;;  %v3047_v35 = vld [vmem:[#allocation5 + $0x530] ss:$8 sps:$4 sm:$0xff]   ;;  %v3050_v38 = vld [vmem:[#allocation5 + $0x420] ss:$8 sps:$4 sm:$0xff]  }
  0x90   :  { %1830 = vmatprep.subr.bf16.mxu1 %v2967_v39  ;;  %v3053_v39 = vld [vmem:[#allocation5 + $0x520] ss:$8 sps:$4 sm:$0xff]  }
  0x92   :  { %1790 = vmatpush1.bf16.msra.mxu0 %v2962_v40  ;;  %v3058_v40 = vld [vmem:[#allocation5 + $0x414] ss:$8 sps:$4 sm:$0xff]  }
  0x93   :  { %1831 = vmatpush1.bf16.msra.mxu1 %v2965_v41  ;;  %1791 = vmatprep.subr.bf16.mxu0 %v2970_v42  ;;  %v3061_v41 = vld [vmem:[#allocation5 + $0x514] ss:$8 sps:$4 sm:$0xff]   ;;  %v3056_v42 = vld [vmem:[#allocation5 + $0x410] ss:$8 sps:$4 sm:$0xff]  }
  0x94   :  { %1832 = vmatprep.subr.bf16.mxu1 %v2973_v43  ;;  %v3059_v43 = vld [vmem:[#allocation5 + $0x510] ss:$8 sps:$4 sm:$0xff]  }
  0x96   :  { %1792 = vmatpush2.bf16.msra.mxu0 %v2968_v44  ;;  %v3064_v44 = vld [vmem:[#allocation5 + $0x404] ss:$8 sps:$4 sm:$0xff]  }
  0x97   :  { %1833 = vmatpush2.bf16.msra.mxu1 %v2971_v45  ;;  %1793 = vmatprep.subr.bf16.mxu0 %v2976_v46  ;;  %v3067_v45 = vld [vmem:[#allocation5 + $0x504] ss:$8 sps:$4 sm:$0xff]   ;;  %v3062_v46 = vld [vmem:[#allocation5 + $0x400] ss:$8 sps:$4 sm:$0xff]  }
  0x98   :  { %1834 = vmatprep.subr.bf16.mxu1 %v2979_v47  ;;  %v3065_v47 = vld [vmem:[#allocation5 + $0x500] ss:$8 sps:$4 sm:$0xff]  }
  0x9a   :  { %1794 = vmatpush2.bf16.msra.mxu0 %v2974_v48  ;;  %v3070_v48 = vld [vmem:[#allocation5 + $0x4f4] ss:$8 sps:$4 sm:$0xff]  }
  0x9b   :  { %1835 = vmatpush2.bf16.msra.mxu1 %v2977_v49  ;;  %1795 = vmatprep.subr.bf16.mxu0 %v2982_v50  ;;  %v3073_v49 = vld [vmem:[#allocation5 + $0x5f4] ss:$8 sps:$4 sm:$0xff]   ;;  %v3068_v50 = vld [vmem:[#allocation5 + $0x4f0] ss:$8 sps:$4 sm:$0xff]  }
  0x9c   :  { %1836 = vmatprep.subr.bf16.mxu1 %v2985_v51  ;;  %v3071_v51 = vld [vmem:[#allocation5 + $0x5f0] ss:$8 sps:$4 sm:$0xff]  }
  0x9e   :  { %1796 = vmatpush2.bf16.msra.mxu0 %v2980_v52  ;;  %v3076_v52 = vld [vmem:[#allocation5 + $0x4e4] ss:$8 sps:$4 sm:$0xff]  }
  0x9f   :  { %1837 = vmatpush2.bf16.msra.mxu1 %v2983_v53  ;;  %1797 = vmatprep.subr.bf16.mxu0 %v2988_v54  ;;  %v3079_v53 = vld [vmem:[#allocation5 + $0x5e4] ss:$8 sps:$4 sm:$0xff]   ;;  %v3074_v54 = vld [vmem:[#allocation5 + $0x4e0] ss:$8 sps:$4 sm:$0xff]  }
  0xa0   :  { %1838 = vmatprep.subr.bf16.mxu1 %v2991_v55  ;;  %v3077_v55 = vld [vmem:[#allocation5 + $0x5e0] ss:$8 sps:$4 sm:$0xff]  }
  0xa2   :  { %1798 = vmatpush2.bf16.msra.mxu0 %v2986_v56  ;;  %v3082_v56 = vld [vmem:[#allocation5 + $0x4d4] ss:$8 sps:$4 sm:$0xff]  }
  0xa3   :  { %1839 = vmatpush2.bf16.msra.mxu1 %v2989_v57  ;;  %1799 = vmatprep.subr.bf16.mxu0 %v2994_v58  ;;  %v3085_v57 = vld [vmem:[#allocation5 + $0x5d4] ss:$8 sps:$4 sm:$0xff]   ;;  %v3080_v58 = vld [vmem:[#allocation5 + $0x4d0] ss:$8 sps:$4 sm:$0xff]  }
  0xa4   :  { %1840 = vmatprep.subr.bf16.mxu1 %v2997_v59  ;;  %v3083_v59 = vld [vmem:[#allocation5 + $0x5d0] ss:$8 sps:$4 sm:$0xff]  }
  0xa6   :  { %1800 = vmatpush2.bf16.msra.mxu0 %v2992_v60  ;;  %v3088_v60 = vld [vmem:[#allocation5 + $0x4c4] ss:$8 sps:$4 sm:$0xff]  }
  0xa7   :  { %1841 = vmatpush2.bf16.msra.mxu1 %v2995_v61  ;;  %1801 = vmatprep.subr.bf16.mxu0 %v3000_v62  ;;  %v3091_v61 = vld [vmem:[#allocation5 + $0x5c4] ss:$8 sps:$4 sm:$0xff]   ;;  %v3086_v62 = vld [vmem:[#allocation5 + $0x4c0] ss:$8 sps:$4 sm:$0xff]  }
  0xa8   :  { %1842 = vmatprep.subr.bf16.mxu1 %v3003_v63  ;;  %v3089_v63 = vld [vmem:[#allocation5 + $0x5c0] ss:$8 sps:$4 sm:$0xff]  }
  0xaa   :  { %1802 = vmatpush2.bf16.msra.mxu0 %v2998_v0  ;;  %v3094_v0 = vld [vmem:[#allocation5 + $0x4b4] ss:$8 sps:$4 sm:$0xff]  }
  0xab   :  { %1843 = vmatpush2.bf16.msra.mxu1 %v3001_v1  ;;  %1803 = vmatprep.subr.bf16.mxu0 %v3006_v2  ;;  %v3097_v1 = vld [vmem:[#allocation5 + $0x5b4] ss:$8 sps:$4 sm:$0xff]   ;;  %v3092_v2 = vld [vmem:[#allocation5 + $0x4b0] ss:$8 sps:$4 sm:$0xff]  }
  0xac   :  { %1844 = vmatprep.subr.bf16.mxu1 %v3009_v3  ;;  %v3095_v3 = vld [vmem:[#allocation5 + $0x5b0] ss:$8 sps:$4 sm:$0xff]  }
  0xae   :  { %1804 = vmatpush2.bf16.msra.mxu0 %v3004_v4  ;;  %v3100_v4 = vld [vmem:[#allocation5 + $0x4a4] ss:$8 sps:$4 sm:$0xff]  }
  0xaf   :  { %1845 = vmatpush2.bf16.msra.mxu1 %v3007_v5  ;;  %1805 = vmatprep.subr.bf16.mxu0 %v3012_v6  ;;  %v3103_v5 = vld [vmem:[#allocation5 + $0x5a4] ss:$8 sps:$4 sm:$0xff]   ;;  %v3098_v6 = vld [vmem:[#allocation5 + $0x4a0] ss:$8 sps:$4 sm:$0xff]  }
  0xb0   :  { %1846 = vmatprep.subr.bf16.mxu1 %v3015_v7  ;;  %v3101_v7 = vld [vmem:[#allocation5 + $0x5a0] ss:$8 sps:$4 sm:$0xff]  }
  0xb2   :  { %1806 = vmatpush2.bf16.msra.mxu0 %v3010_v8  ;;  %v3106_v8 = vld [vmem:[#allocation5 + $0x494] ss:$8 sps:$4 sm:$0xff]  }
  0xb3   :  { %1847 = vmatpush2.bf16.msra.mxu1 %v3013_v9  ;;  %1857 = vmatprep.subr.bf16.mxu0 %v3022_v10  ;;  %v3109_v9 = vld [vmem:[#allocation5 + $0x594] ss:$8 sps:$4 sm:$0xff]   ;;  %v3104_v10 = vld [vmem:[#allocation5 + $0x490] ss:$8 sps:$4 sm:$0xff]  }
  0xb4   :  { %1898 = vmatprep.subr.bf16.mxu1 %v3025_v11  ;;  %v3107_v11 = vld [vmem:[#allocation5 + $0x590] ss:$8 sps:$4 sm:$0xff]  }
  0xb5   :  { %1808 = vmatmul.mubr.bf16.vlgmr.msra.gmra.mxu0 %v2472_v12  ;;  %v3112_v12 = vld [vmem:[#allocation5 + $0x484] ss:$8 sps:$4 sm:$0xff]  }
  0xb6   :  { %1849 = vmatmul.mubr.bf16.vlgmr.msra.gmra.mxu1 %v2474_v13  ;;  %1858 = vmatpush1.bf16.msra.mxu0 %v3020_v14  ;;  %v3115_v13 = vld [vmem:[#allocation5 + $0x584] ss:$8 sps:$4 sm:$0xff]   ;;  %v3110_v14 = vld [vmem:[#allocation5 + $0x480] ss:$8 sps:$4 sm:$0xff]  }
  0xb7   :  { %1899 = vmatpush1.bf16.msra.mxu1 %v3023_v15  ;;  %1859 = vmatprep.subr.bf16.mxu0 %v3028_v16  ;;  %v3113_v15 = vld [vmem:[#allocation5 + $0x580] ss:$8 sps:$4 sm:$0xff]   ;;  %v3122_v16 = vld [vmem:[#allocation5 + $0x674] ss:$8 sps:$4 sm:$0xff]  }
  0xb8   :  { %1900 = vmatprep.subr.bf16.mxu1 %v3031_v17  ;;  %1889 = vmatprep.mubr.bf16.mxu0 %v2477_v20  ;;  %v3125_v17 = vld [vmem:[#allocation5 + $0x774] ss:$8 sps:$4 sm:$0xff]  }
  0xb9   :  { %1930 = vmatprep.mubr.bf16.mxu1 %v2479_v21  ;;  %v3473_v20 = vld [vmem:[#allocation2 + $0x30] sm:$0xff]  ;;  %v3475_v21 = vld [vmem:[#allocation2 + $0x38] sm:$0xff] }
  0xba   :  { %1860 = vmatpush1.bf16.msra.mxu0 %v3026_v22  ;;  %v3120_v22 = vld [vmem:[#allocation5 + $0x670] ss:$8 sps:$4 sm:$0xff]  }
  0xbb   :  { %1901 = vmatpush1.bf16.msra.mxu1 %v3029_v23  ;;  %1861 = vmatprep.subr.bf16.mxu0 %v3034_v24  ;;  %v3123_v23 = vld [vmem:[#allocation5 + $0x770] ss:$8 sps:$4 sm:$0xff]   ;;  %v2476_v24 = vcombine.low %v3465_v18, %v3465_v18  ;;  %v3126_v18 = vld [vmem:[#allocation5 + $0x660] ss:$8 sps:$4 sm:$0xff]  }
  0xbc   :  { %1902 = vmatprep.subr.bf16.mxu1 %v3037_v25  ;;  %v2478_v25 = vcombine.low %v3467_v19, %v3467_v19  ;;  %v3134_v19 = vld [vmem:[#allocation5 + $0x654] ss:$8 sps:$4 sm:$0xff]  }
  0xbe   :  { %1862 = vmatpush1.bf16.msra.mxu0 %v3032_v26  ;;  %v3128_v26 = vld [vmem:[#allocation5 + $0x664] ss:$8 sps:$4 sm:$0xff]  }
  0xbf   :  { %1903 = vmatpush1.bf16.msra.mxu1 %v3035_v27  ;;  %1863 = vmatprep.subr.bf16.mxu0 %v3040_v28  ;;  %v3131_v27 = vld [vmem:[#allocation5 + $0x764] ss:$8 sps:$4 sm:$0xff]   ;;  %v2481_v28 = vcombine.high %v3473_v20, %v3473_v20 }
  0xc0   :  { %1904 = vmatprep.subr.bf16.mxu1 %v3043_v29  ;;  %v2483_v29 = vcombine.high %v3475_v21, %v3475_v21 }
  0xc2   :  { %1864 = vmatpush1.bf16.msra.mxu0 %v3038_v30  ;;  %v3129_v30 = vld [vmem:[#allocation5 + $0x760] ss:$8 sps:$4 sm:$0xff]  }
  0xc3   :  { %1905 = vmatpush1.bf16.msra.mxu1 %v3041_v31  ;;  %1865 = vmatprep.subr.bf16.mxu0 %v3046_v32  ;;  %v3137_v31 = vld [vmem:[#allocation5 + $0x754] ss:$8 sps:$4 sm:$0xff]   ;;  %v3132_v32 = vld [vmem:[#allocation5 + $0x650] ss:$8 sps:$4 sm:$0xff]  }
  0xc4   :  { %1906 = vmatprep.subr.bf16.mxu1 %v3049_v33  ;;  %v3135_v33 = vld [vmem:[#allocation5 + $0x750] ss:$8 sps:$4 sm:$0xff]  }
  0xc6   :  { %1866 = vmatpush1.bf16.msra.mxu0 %v3044_v34  ;;  %v3140_v34 = vld [vmem:[#allocation5 + $0x644] ss:$8 sps:$4 sm:$0xff]  }
  0xc7   :  { %1907 = vmatpush1.bf16.msra.mxu1 %v3047_v35  ;;  %1867 = vmatprep.subr.bf16.mxu0 %v3052_v36  ;;  %v3143_v35 = vld [vmem:[#allocation5 + $0x744] ss:$8 sps:$4 sm:$0xff]   ;;  %v3138_v36 = vld [vmem:[#allocation5 + $0x640] ss:$8 sps:$4 sm:$0xff]  }
  0xc8   :  { %1908 = vmatprep.subr.bf16.mxu1 %v3055_v37  ;;  %v3141_v37 = vld [vmem:[#allocation5 + $0x740] ss:$8 sps:$4 sm:$0xff]  }
  0xca   :  { %1868 = vmatpush1.bf16.msra.mxu0 %v3050_v38  ;;  %v3146_v38 = vld [vmem:[#allocation5 + $0x634] ss:$8 sps:$4 sm:$0xff]  }
  0xcb   :  { %1909 = vmatpush1.bf16.msra.mxu1 %v3053_v39  ;;  %1869 = vmatprep.subr.bf16.mxu0 %v3058_v40  ;;  %v3149_v39 = vld [vmem:[#allocation5 + $0x734] ss:$8 sps:$4 sm:$0xff]   ;;  %v3144_v40 = vld [vmem:[#allocation5 + $0x630] ss:$8 sps:$4 sm:$0xff]  }
  0xcc   :  { %1910 = vmatprep.subr.bf16.mxu1 %v3061_v41  ;;  %v3147_v41 = vld [vmem:[#allocation5 + $0x730] ss:$8 sps:$4 sm:$0xff]  }
  0xce   :  { %1870 = vmatpush1.bf16.msra.mxu0 %v3056_v42  ;;  %v3152_v42 = vld [vmem:[#allocation5 + $0x624] ss:$8 sps:$4 sm:$0xff]  }
  0xcf   :  { %1911 = vmatpush1.bf16.msra.mxu1 %v3059_v43  ;;  %1871 = vmatprep.subr.bf16.mxu0 %v3064_v44  ;;  %v3155_v43 = vld [vmem:[#allocation5 + $0x724] ss:$8 sps:$4 sm:$0xff]   ;;  %v3150_v44 = vld [vmem:[#allocation5 + $0x620] ss:$8 sps:$4 sm:$0xff]  }
  0xd0   :  { %1912 = vmatprep.subr.bf16.mxu1 %v3067_v45  ;;  %v3153_v45 = vld [vmem:[#allocation5 + $0x720] ss:$8 sps:$4 sm:$0xff]  }
  0xd2   :  { %1872 = vmatpush1.bf16.msra.mxu0 %v3062_v46  ;;  %v3158_v46 = vld [vmem:[#allocation5 + $0x614] ss:$8 sps:$4 sm:$0xff]  }
  0xd3   :  { %1913 = vmatpush1.bf16.msra.mxu1 %v3065_v47  ;;  %1873 = vmatprep.subr.bf16.mxu0 %v3070_v48  ;;  %v3161_v47 = vld [vmem:[#allocation5 + $0x714] ss:$8 sps:$4 sm:$0xff]   ;;  %v3156_v48 = vld [vmem:[#allocation5 + $0x610] ss:$8 sps:$4 sm:$0xff]  }
  0xd4   :  { %1914 = vmatprep.subr.bf16.mxu1 %v3073_v49  ;;  %v3159_v49 = vld [vmem:[#allocation5 + $0x710] ss:$8 sps:$4 sm:$0xff]  }
  0xd6   :  { %1874 = vmatpush2.bf16.msra.mxu0 %v3068_v50  ;;  %v3164_v50 = vld [vmem:[#allocation5 + $0x604] ss:$8 sps:$4 sm:$0xff]  }
  0xd7   :  { %1915 = vmatpush2.bf16.msra.mxu1 %v3071_v51  ;;  %1875 = vmatprep.subr.bf16.mxu0 %v3076_v52  ;;  %v3167_v51 = vld [vmem:[#allocation5 + $0x704] ss:$8 sps:$4 sm:$0xff]   ;;  %v3162_v52 = vld [vmem:[#allocation5 + $0x600] ss:$8 sps:$4 sm:$0xff]  }
  0xd8   :  { %1916 = vmatprep.subr.bf16.mxu1 %v3079_v53  ;;  %v3165_v53 = vld [vmem:[#allocation5 + $0x700] ss:$8 sps:$4 sm:$0xff]  }
  0xda   :  { %1876 = vmatpush2.bf16.msra.mxu0 %v3074_v54  ;;  %v3170_v54 = vld [vmem:[#allocation5 + $0x6f4] ss:$8 sps:$4 sm:$0xff]  }
  0xdb   :  { %1917 = vmatpush2.bf16.msra.mxu1 %v3077_v55  ;;  %1877 = vmatprep.subr.bf16.mxu0 %v3082_v56  ;;  %v3173_v55 = vld [vmem:[#allocation5 + $0x7f4] ss:$8 sps:$4 sm:$0xff]   ;;  %v3168_v56 = vld [vmem:[#allocation5 + $0x6f0] ss:$8 sps:$4 sm:$0xff]  }
  0xdc   :  { %1918 = vmatprep.subr.bf16.mxu1 %v3085_v57  ;;  %v3171_v57 = vld [vmem:[#allocation5 + $0x7f0] ss:$8 sps:$4 sm:$0xff]  }
  0xde   :  { %1878 = vmatpush2.bf16.msra.mxu0 %v3080_v58  ;;  %v3176_v58 = vld [vmem:[#allocation5 + $0x6e4] ss:$8 sps:$4 sm:$0xff]  }
  0xdf   :  { %1919 = vmatpush2.bf16.msra.mxu1 %v3083_v59  ;;  %1879 = vmatprep.subr.bf16.mxu0 %v3088_v60  ;;  %v3179_v59 = vld [vmem:[#allocation5 + $0x7e4] ss:$8 sps:$4 sm:$0xff]   ;;  %v3174_v60 = vld [vmem:[#allocation5 + $0x6e0] ss:$8 sps:$4 sm:$0xff]  }
  0xe0   :  { %1920 = vmatprep.subr.bf16.mxu1 %v3091_v61  ;;  %v3177_v61 = vld [vmem:[#allocation5 + $0x7e0] ss:$8 sps:$4 sm:$0xff]  }
  0xe2   :  { %1880 = vmatpush2.bf16.msra.mxu0 %v3086_v62  ;;  %v3182_v62 = vld [vmem:[#allocation5 + $0x6d4] ss:$8 sps:$4 sm:$0xff]  }
  0xe3   :  { %1921 = vmatpush2.bf16.msra.mxu1 %v3089_v63  ;;  %1881 = vmatprep.subr.bf16.mxu0 %v3094_v0  ;;  %v3185_v63 = vld [vmem:[#allocation5 + $0x7d4] ss:$8 sps:$4 sm:$0xff]   ;;  %v3180_v0 = vld [vmem:[#allocation5 + $0x6d0] ss:$8 sps:$4 sm:$0xff]  }
  0xe4   :  { %1922 = vmatprep.subr.bf16.mxu1 %v3097_v1  ;;  %v3183_v1 = vld [vmem:[#allocation5 + $0x7d0] ss:$8 sps:$4 sm:$0xff]  }
  0xe6   :  { %1882 = vmatpush2.bf16.msra.mxu0 %v3092_v2  ;;  %v3188_v2 = vld [vmem:[#allocation5 + $0x6c4] ss:$8 sps:$4 sm:$0xff]  }
  0xe7   :  { %1923 = vmatpush2.bf16.msra.mxu1 %v3095_v3  ;;  %1883 = vmatprep.subr.bf16.mxu0 %v3100_v4  ;;  %v3191_v3 = vld [vmem:[#allocation5 + $0x7c4] ss:$8 sps:$4 sm:$0xff]   ;;  %v3186_v4 = vld [vmem:[#allocation5 + $0x6c0] ss:$8 sps:$4 sm:$0xff]  }
  0xe8   :  { %1924 = vmatprep.subr.bf16.mxu1 %v3103_v5  ;;  %v3189_v5 = vld [vmem:[#allocation5 + $0x7c0] ss:$8 sps:$4 sm:$0xff]  }
  0xea   :  { %1884 = vmatpush2.bf16.msra.mxu0 %v3098_v6  ;;  %v3194_v6 = vld [vmem:[#allocation5 + $0x6b4] ss:$8 sps:$4 sm:$0xff]  }
  0xeb   :  { %1925 = vmatpush2.bf16.msra.mxu1 %v3101_v7  ;;  %1885 = vmatprep.subr.bf16.mxu0 %v3106_v8  ;;  %v3197_v7 = vld [vmem:[#allocation5 + $0x7b4] ss:$8 sps:$4 sm:$0xff]   ;;  %v3192_v8 = vld [vmem:[#allocation5 + $0x6b0] ss:$8 sps:$4 sm:$0xff]  }
  0xec   :  { %1926 = vmatprep.subr.bf16.mxu1 %v3109_v9  ;;  %v3195_v9 = vld [vmem:[#allocation5 + $0x7b0] ss:$8 sps:$4 sm:$0xff]  }
  0xee   :  { %1886 = vmatpush2.bf16.msra.mxu0 %v3104_v10  ;;  %v3200_v10 = vld [vmem:[#allocation5 + $0x6a4] ss:$8 sps:$4 sm:$0xff]  }
  0xef   :  { %1927 = vmatpush2.bf16.msra.mxu1 %v3107_v11  ;;  %1887 = vmatprep.subr.bf16.mxu0 %v3112_v12  ;;  %v3203_v11 = vld [vmem:[#allocation5 + $0x7a4] ss:$8 sps:$4 sm:$0xff]   ;;  %v3198_v12 = vld [vmem:[#allocation5 + $0x6a0] ss:$8 sps:$4 sm:$0xff]  }
  0xf0   :  { %1928 = vmatprep.subr.bf16.mxu1 %v3115_v13  ;;  %v3201_v13 = vld [vmem:[#allocation5 + $0x7a0] ss:$8 sps:$4 sm:$0xff]  }
  0xf2   :  { %1888 = vmatpush2.bf16.msra.mxu0 %v3110_v14  ;;  %v347_v14 = vlaneseq }
  0xf3   :  { %1929 = vmatpush2.bf16.msra.mxu1 %v3113_v15  ;;  %1939 = vmatprep.subr.bf16.mxu0 %v3122_v16  ;;  %v3206_v15 = vld [vmem:[#allocation5 + $0x694] ss:$8 sps:$4 sm:$0xff]  }
  0xf4   :  { %1980 = vmatprep.subr.bf16.mxu1 %v3125_v17  ;;  %v3209_v16 = vld [vmem:[#allocation5 + $0x794] ss:$8 sps:$4 sm:$0xff]   ;;  %v3204_v17 = vld [vmem:[#allocation5 + $0x690] ss:$8 sps:$4 sm:$0xff]  }
  0xf5   :  { %1890 = vmatmul.mubr.bf16.vlgmr.msra.gmra.mxu0 %v2476_v24  ;;  %v3212_v24 = vld [vmem:[#allocation5 + $0x684] ss:$8 sps:$4 sm:$0xff]  }
  0xf6   :  { %1931 = vmatmul.mubr.bf16.vlgmr.msra.gmra.mxu1 %v2478_v25  ;;  %1940 = vmatpush1.bf16.msra.mxu0 %v3120_v22  ;;  %v3207_v22 = vld [vmem:[#allocation5 + $0x790] ss:$8 sps:$4 sm:$0xff]   ;;  %v3215_v25 = vld [vmem:[#allocation5 + $0x784] ss:$8 sps:$4 sm:$0xff]  }
  0xf7   :  { %1981 = vmatpush1.bf16.msra.mxu1 %v3123_v23  ;;  %1941 = vmatprep.subr.bf16.mxu0 %v3128_v26  ;;  %v3485_v23 = vshrl.u32 %v347_v14, 7  ;;  %v3210_v26 = vld [vmem:[#allocation5 + $0x680] ss:$8 sps:$4 sm:$0xff]  }
  0xf8   :  { %1982 = vmatprep.subr.bf16.mxu1 %v3131_v27  ;;  %1971 = vmatprep.mubr.bf16.mxu0 %v2481_v28  ;;  %v3213_v27 = vld [vmem:[#allocation5 + $0x780] ss:$8 sps:$4 sm:$0xff]  }
  0xf9   :  { %2012 = vmatprep.mubr.bf16.mxu1 %v2483_v29  ;;  %v349_v28 = vsub.s32 0, %v3485_v23  ;;  %v345_v29 = vld [vmem:[%s3521_s2] sm:$0x3] }
  0xfa   :  { %1942 = vmatpush1.bf16.msra.mxu0 %v3126_v18  ;;  %v353_v18 = vsub.s32 1, %v3485_v23 }
  0xfb   :  { %1983 = vmatpush1.bf16.msra.mxu1 %v3129_v30  ;;  %1943 = vmatprep.subr.bf16.mxu0 %v3134_v19  ;;  %v2480_v30 = vcombine.low %v3473_v20, %v3473_v20  ;;  %v2482_v19 = vcombine.low %v3475_v21, %v3475_v21 }
  0xfc   :  { %1984 = vmatprep.subr.bf16.mxu1 %v3137_v31  ;;  %v350_v31 = vrot.slane %v345_v29, %v349_v28 }
  0xfe   :  { %1944 = vmatpush1.bf16.msra.mxu0 %v3132_v32  ;;  %v354_v32 = vrot.slane %v345_v29, %v353_v18  ;;  %v3268_v29 = vld [vmem:[#allocation8 + $0x78] sm:$0xff]  }
  0xff   :  { %1985 = vmatpush1.bf16.msra.mxu1 %v3135_v33  ;;  %1945 = vmatprep.subr.bf16.mxu0 %v3140_v34 }
 0x100   :  { %1986 = vmatprep.subr.bf16.mxu1 %v3143_v35 }
 0x102   :  { %1946 = vmatpush1.bf16.msra.mxu0 %v3138_v36 }
 0x103   :  { %1987 = vmatpush1.bf16.msra.mxu1 %v3141_v37  ;;  %1947 = vmatprep.subr.bf16.mxu0 %v3146_v38 }
 0x104   :  { %1988 = vmatprep.subr.bf16.mxu1 %v3149_v39 }
 0x106   :  { %1948 = vmatpush1.bf16.msra.mxu0 %v3144_v40 }
 0x107   :  { %1989 = vmatpush1.bf16.msra.mxu1 %v3147_v41  ;;  %1949 = vmatprep.subr.bf16.mxu0 %v3152_v42 }
 0x108   :  { %1990 = vmatprep.subr.bf16.mxu1 %v3155_v43  ;;  %v3220_v43 = vld [vmem:[#allocation7 + $0x70] ss:$8 sps:$4 sm:$0xff]  }
 0x10a   :  { %1950 = vmatpush1.bf16.msra.mxu0 %v3150_v44  ;;  %v3222_v44 = vld [vmem:[#allocation7 + $0x74] ss:$8 sps:$4 sm:$0xff]  }
 0x10b   :  { %1991 = vmatpush1.bf16.msra.mxu1 %v3153_v45  ;;  %1951 = vmatprep.subr.bf16.mxu0 %v3158_v46  ;;  %v3225_v45 = vld [vmem:[#allocation7 + $0x64] ss:$8 sps:$4 sm:$0xff]   ;;  %v3223_v46 = vld [vmem:[#allocation7 + $0x60] ss:$8 sps:$4 sm:$0xff]  }
 0x10c   :  { %1992 = vmatprep.subr.bf16.mxu1 %v3161_v47  ;;  %v3228_v47 = vld [vmem:[#allocation7 + $0x54] ss:$8 sps:$4 sm:$0xff]  }
 0x10e   :  { %1952 = vmatpush1.bf16.msra.mxu0 %v3156_v48  ;;  %v3226_v48 = vld [vmem:[#allocation7 + $0x50] ss:$8 sps:$4 sm:$0xff]  }
 0x10f   :  { %1993 = vmatpush1.bf16.msra.mxu1 %v3159_v49  ;;  %1953 = vmatprep.subr.bf16.mxu0 %v3164_v50  ;;  %v3231_v49 = vld [vmem:[#allocation7 + $0x44] ss:$8 sps:$4 sm:$0xff]   ;;  %v3229_v50 = vld [vmem:[#allocation7 + $0x40] ss:$8 sps:$4 sm:$0xff]  }
 0x110   :  { %1994 = vmatprep.subr.bf16.mxu1 %v3167_v51  ;;  %v3234_v51 = vld [vmem:[#allocation7 + $0x34] ss:$8 sps:$4 sm:$0xff]  }
 0x112   :  { %1954 = vmatpush1.bf16.msra.mxu0 %v3162_v52  ;;  %v3232_v52 = vld [vmem:[#allocation7 + $0x30] ss:$8 sps:$4 sm:$0xff]  }
 0x113   :  { %1995 = vmatpush1.bf16.msra.mxu1 %v3165_v53  ;;  %1955 = vmatprep.subr.bf16.mxu0 %v3170_v54  ;;  %v3237_v53 = vld [vmem:[#allocation7 + $0x24] ss:$8 sps:$4 sm:$0xff]   ;;  %v3235_v54 = vld [vmem:[#allocation7 + $0x20] ss:$8 sps:$4 sm:$0xff]  }
 0x114   :  { %1996 = vmatprep.subr.bf16.mxu1 %v3173_v55  ;;  %v3240_v55 = vld [vmem:[#allocation7 + $0x14] ss:$8 sps:$4 sm:$0xff]  }
 0x116   :  { %1956 = vmatpush2.bf16.msra.mxu0 %v3168_v56  ;;  %v3238_v56 = vld [vmem:[#allocation7 + $0x10] ss:$8 sps:$4 sm:$0xff]  }
 0x117   :  { %1997 = vmatpush2.bf16.msra.mxu1 %v3171_v57  ;;  %1957 = vmatprep.subr.bf16.mxu0 %v3176_v58  ;;  %v3243_v57 = vld [vmem:[#allocation7 + $0x4] ss:$8 sps:$4 sm:$0xff]   ;;  %v3241_v58 = vld [vmem:[#allocation7] ss:$8 sps:$4 sm:$0xff]  }
 0x118   :  { %1998 = vmatprep.subr.bf16.mxu1 %v3179_v59  ;;  %v3246_v59 = vld [vmem:[#allocation7 + $0xf4] ss:$8 sps:$4 sm:$0xff]  }
 0x11a   :  { %1958 = vmatpush2.bf16.msra.mxu0 %v3174_v60  ;;  %v3244_v60 = vld [vmem:[#allocation7 + $0xf0] ss:$8 sps:$4 sm:$0xff]  }
 0x11b   :  { %1999 = vmatpush2.bf16.msra.mxu1 %v3177_v61  ;;  %1959 = vmatprep.subr.bf16.mxu0 %v3182_v62  ;;  %v3249_v61 = vld [vmem:[#allocation7 + $0xe4] ss:$8 sps:$4 sm:$0xff]   ;;  %v3247_v62 = vld [vmem:[#allocation7 + $0xe0] ss:$8 sps:$4 sm:$0xff]  }
 0x11c   :  { %2000 = vmatprep.subr.bf16.mxu1 %v3185_v63  ;;  %v3252_v63 = vld [vmem:[#allocation7 + $0xd4] ss:$8 sps:$4 sm:$0xff]  }
 0x11e   :  { %1960 = vmatpush2.bf16.msra.mxu0 %v3180_v0  ;;  %v3250_v0 = vld [vmem:[#allocation7 + $0xd0] ss:$8 sps:$4 sm:$0xff]  }
 0x11f   :  { %2001 = vmatpush2.bf16.msra.mxu1 %v3183_v1  ;;  %1961 = vmatprep.subr.bf16.mxu0 %v3188_v2  ;;  %v3255_v1 = vld [vmem:[#allocation7 + $0xc4] ss:$8 sps:$4 sm:$0xff]   ;;  %v3253_v2 = vld [vmem:[#allocation7 + $0xc0] ss:$8 sps:$4 sm:$0xff]  }
 0x120   :  { %2002 = vmatprep.subr.bf16.mxu1 %v3191_v3  ;;  %v3258_v3 = vld [vmem:[#allocation7 + $0xb4] ss:$8 sps:$4 sm:$0xff]  }
 0x122   :  { %1962 = vmatpush2.bf16.msra.mxu0 %v3186_v4  ;;  %v3256_v4 = vld [vmem:[#allocation7 + $0xb0] ss:$8 sps:$4 sm:$0xff]  }
 0x123   :  { %2003 = vmatpush2.bf16.msra.mxu1 %v3189_v5  ;;  %1963 = vmatprep.subr.bf16.mxu0 %v3194_v6  ;;  %v3261_v5 = vld [vmem:[#allocation7 + $0xa4] ss:$8 sps:$4 sm:$0xff]   ;;  %v3259_v6 = vld [vmem:[#allocation7 + $0xa0] ss:$8 sps:$4 sm:$0xff]  }
 0x124   :  { %2004 = vmatprep.subr.bf16.mxu1 %v3197_v7 }
 0x126   :  { %1964 = vmatpush2.bf16.msra.mxu0 %v3192_v8 }
 0x127   :  { %2005 = vmatpush2.bf16.msra.mxu1 %v3195_v9  ;;  %1965 = vmatprep.subr.bf16.mxu0 %v3200_v10 }
 0x128   :  { %2006 = vmatprep.subr.bf16.mxu1 %v3203_v11 }
 0x12a   :  { %1966 = vmatpush2.bf16.msra.mxu0 %v3198_v12  ;;  %v3264_v12 = vld [vmem:[#allocation7 + $0x94] ss:$8 sps:$4 sm:$0xff]  }
 0x12b   :  { %2007 = vmatpush2.bf16.msra.mxu1 %v3201_v13  ;;  %1967 = vmatprep.subr.bf16.mxu0 %v3206_v15  ;;  %v3262_v15 = vld [vmem:[#allocation7 + $0x90] ss:$8 sps:$4 sm:$0xff]  }
 0x12c   :  { %2008 = vmatprep.subr.bf16.mxu1 %v3209_v16 }
 0x12e   :  { %1968 = vmatpush2.bf16.msra.mxu0 %v3204_v17 }
 0x12f   :  { %2009 = vmatpush2.bf16.msra.mxu1 %v3207_v22  ;;  %1969 = vmatprep.subr.bf16.mxu0 %v3212_v24 }
 0x130   :  { %2010 = vmatprep.subr.bf16.mxu1 %v3215_v25 }
 0x132   :  { %1970 = vmatpush2.bf16.msra.mxu0 %v3210_v26  ;;  %v3267_v26 = vld [vmem:[#allocation7 + $0x84] ss:$8 sps:$4 sm:$0xff]  }
 0x133   :  { %2011 = vmatpush2.bf16.msra.mxu1 %v3213_v27  ;;  %2229 = vmatprep.subr.bf16.mxu0 %v3222_v44  ;;  %v3265_v27 = vld [vmem:[#allocation7 + $0x80] ss:$8 sps:$4 sm:$0xff]  }
 0x134   :  { %2789 = vmatprep.subr.bf16.mxu1 %v3268_v29 }
 0x135   :  { %v1727_v33 = vpop.f32.mrf.mxu0  ;;  %1972 = vmatmul.mubr.bf16.vlgmr.msra.gmra.mxu0 %v2480_v30  ;;  %v3269_v30 = vld [vmem:[#allocation8 + $0x38] sm:$0xff]  }
 0x136   :  { %v1768_v34 = vpop.f32.mrf.mxu1  ;;  %2013 = vmatmul.mubr.bf16.vlgmr.msra.gmra.mxu1 %v2482_v19  ;;  %v1728_v35 = vadd.f32 %v1727_v33, %v350_v31  ;;  %2230 = vmatpush1.bf16.msra.mxu0 %v3220_v43  ;;  %v3270_v19 = vld [vmem:[#allocation8 + $0x70] sm:$0xff]   ;;  %v3273_v33 = vld [vmem:[#allocation8 + $0x28] sm:$0xff]  }
 0x137   :  { %v1729_v36 = vpop.f32.mrf.mxu0  ;;  %2231 = vmatprep.subr.bf16.mxu0 %v3225_v45  ;;  %2790 = vmatpush3.bf16.msra.mxu1 %v3269_v30  ;;  %v3271_v31 = vld [vmem:[#allocation8 + $0x30] sm:$0xff]  }
 0x138   :  { %v1770_v37 = vpop.f32.mrf.mxu1  ;;  %v3500_v38 = vadd.f32 %v1768_v34, %v1728_v35  ;;  %v1730_v20 = vadd.f32 %v1729_v36, %v354_v32  ;;  %2791 = vmatprep.subr.bf16.mxu1 %v3270_v19  ;;  %v3272_v32 = vld [vmem:[#allocation8 + $0x68] sm:$0xff]   ;;  %v3274_v34 = vld [vmem:[#allocation8 + $0x60] sm:$0xff]   ;;  %v3276_v36 = vld [vmem:[#allocation8 + $0x58] sm:$0xff]  }
 0x139   :  { %v1731_v39 = vpop.f32.mrf.mxu0  ;;  %v3275_v35 = vld [vmem:[#allocation8 + $0x20] sm:$0xff]  }
 0x13a   :  { %v1772_v21 = vpop.f32.mrf.mxu1  ;;  %v3502_v40 = vadd.f32 %v1770_v37, %v1730_v20  ;;  %2232 = vmatpush1.bf16.msra.mxu0 %v3223_v46  ;;  %v3277_v37 = vld [vmem:[#allocation8 + $0x18] sm:$0xff]   ;;  %v3279_v20 = vld [vmem:[#allocation8 + $0x10] sm:$0xff]  }
 0x13b   :  { %v1732_v41 = vpop.f32.mrf.mxu0  ;;  %2233 = vmatprep.subr.bf16.mxu0 %v3228_v47  ;;  %2792 = vmatpush3.bf16.msra.mxu1 %v3271_v31 }
 0x13c   :  { %v1773_v42 = vpop.f32.mrf.mxu1  ;;  %2793 = vmatprep.subr.bf16.mxu1 %v3272_v32 }
 0x13e   :  { %2234 = vmatpush1.bf16.msra.mxu0 %v3226_v48 }
 0x13f   :  { %2235 = vmatprep.subr.bf16.mxu0 %v3231_v49  ;;  %2794 = vmatpush3.bf16.msra.mxu1 %v3273_v33 }
 0x140   :  { %2795 = vmatprep.subr.bf16.mxu1 %v3274_v34 }
 0x142   :  { %2236 = vmatpush1.bf16.msra.mxu0 %v3229_v50 }
 0x143   :  { %2237 = vmatprep.subr.bf16.mxu0 %v3234_v51  ;;  %2796 = vmatpush3.bf16.msra.mxu1 %v3275_v35 }
 0x144   :  { %2797 = vmatprep.subr.bf16.mxu1 %v3276_v36 }
 0x146   :  { %2238 = vmatpush1.bf16.msra.mxu0 %v3232_v52 }
 0x147   :  { %2239 = vmatprep.subr.bf16.mxu0 %v3237_v53  ;;  %2798 = vmatpush3.bf16.msra.mxu1 %v3277_v37 }
 0x14a   :  { %2240 = vmatpush1.bf16.msra.mxu0 %v3235_v54 }
 0x14b   :  { %2241 = vmatprep.subr.bf16.mxu0 %v3240_v55 }
 0x14e   :  { %2242 = vmatpush1.bf16.msra.mxu0 %v3238_v56 }
 0x14f   :  { %2243 = vmatprep.subr.bf16.mxu0 %v3243_v57 }
 0x152   :  { %2244 = vmatpush1.bf16.msra.mxu0 %v3241_v58 }
 0x153   :  { %2245 = vmatprep.subr.bf16.mxu0 %v3246_v59 }
 0x156   :  { %2246 = vmatpush2.bf16.msra.mxu0 %v3244_v60 }
 0x157   :  { %2247 = vmatprep.subr.bf16.mxu0 %v3249_v61 }
 0x15a   :  { %2248 = vmatpush2.bf16.msra.mxu0 %v3247_v62 }
 0x15b   :  { %2249 = vmatprep.subr.bf16.mxu0 %v3252_v63 }
 0x15e   :  { %2250 = vmatpush2.bf16.msra.mxu0 %v3250_v0 }
 0x15f   :  { %2251 = vmatprep.subr.bf16.mxu0 %v3255_v1 }
 0x162   :  { %2252 = vmatpush2.bf16.msra.mxu0 %v3253_v2  ;;  %v3280_v2 = vld [vmem:[#allocation8 + $0x48] sm:$0xff]  }
 0x163   :  { %2253 = vmatprep.subr.bf16.mxu0 %v3258_v3  ;;  %v3281_v3 = vld [vmem:[#allocation8 + $0x8] sm:$0xff]  }
 0x166   :  { %2254 = vmatpush2.bf16.msra.mxu0 %v3256_v4  ;;  %v3282_v4 = vld [vmem:[#allocation8 + $0x40] sm:$0xff]  }
 0x167   :  { %2255 = vmatprep.subr.bf16.mxu0 %v3261_v5  ;;  %v3283_v5 = vld [vmem:[#allocation8] sm:$0xff]  }
 0x16a   :  { %2256 = vmatpush2.bf16.msra.mxu0 %v3259_v6  ;;  %v2057_v6 = vld [vmem:[%s3523_s4] sm:$0x3] }
 0x16b   :  { %2257 = vmatprep.subr.bf16.mxu0 %v3264_v12 }
 0x16e   :  { %2258 = vmatpush2.bf16.msra.mxu0 %v3262_v15 }
 0x16f   :  { %2259 = vmatprep.subr.bf16.mxu0 %v3267_v26 }
 0x172   :  { %2260 = vmatpush2.bf16.msra.mxu0 %v3265_v27 }
 0x175   :  { %v1809_v7 = vpop.f32.mrf.mxu0 }
 0x176   :  { %v1850_v8 = vpop.f32.mrf.mxu1  ;;  %v1810_v9 = vadd.f32 %v1809_v7, %v3500_v38  ;;  %v3278_v38 = vld [vmem:[#allocation8 + $0x50] sm:$0xff]   ;;  %v2062_v7 = vrot.slane %v2057_v6, %v349_v28  ;;  %v2772_v28 = vld [vmem:[%s3525_s6] ss:$0 sm:$0xff] }
 0x177   :  { %v1811_v10 = vpop.f32.mrf.mxu0  ;;  %2799 = vmatprep.subr.bf16.mxu1 %v3278_v38 }
 0x178   :  { %v1852_v11 = vpop.f32.mrf.mxu1  ;;  %v1851_v13 = vadd.f32 %v1850_v8, %v1810_v9  ;;  %v1812_v14 = vadd.f32 %v1811_v10, %v3502_v40  ;;  %2800 = vmatpush3.bf16.msra.mxu1 %v3279_v20  ;;  %v2066_v8 = vrot.slane %v2057_v6, %v353_v18 }
 0x179   :  { %v1813_v16 = vpop.f32.mrf.mxu0  ;;  %2801 = vmatprep.subr.bf16.mxu1 %v3280_v2 }
 0x17a   :  { %v1854_v17 = vpop.f32.mrf.mxu1  ;;  %v1853_v22 = vadd.f32 %v1852_v11, %v1812_v14 }
 0x17b   :  { %v1814_v24 = vpop.f32.mrf.mxu0 }
 0x17c   :  { %v1855_v25 = vpop.f32.mrf.mxu1  ;;  %2802 = vmatpush3.bf16.msra.mxu1 %v3281_v3 }
 0x17d   :  { %2803 = vmatprep.subr.bf16.mxu1 %v3282_v4 }
 0x180   :  { %2804 = vmatpush3.bf16.msra.mxu1 %v3283_v5 }
 0x1b5   :  { %v1891_v39 = vpop.f32.mrf.mxu0 }
 0x1b6   :  { %v1932_v21 = vpop.f32.mrf.mxu1  ;;  %v1892_v40 = vadd.f32 %v1891_v39, %v1851_v13 }
 0x1b7   :  { %v1893_v41 = vpop.f32.mrf.mxu0 }
 0x1b8   :  { %v1934_v42 = vpop.f32.mrf.mxu1  ;;  %v1933_v43 = vadd.f32 %v1932_v21, %v1892_v40  ;;  %v1894_v48 = vadd.f32 %v1893_v41, %v1853_v22 }
 0x1b9   :  { %v1895_v44 = vpop.f32.mrf.mxu0 }
 0x1ba   :  { %v1936_v45 = vpop.f32.mrf.mxu1  ;;  %v1935_v51 = vadd.f32 %v1934_v42, %v1894_v48 }
 0x1bb   :  { %v1896_v46 = vpop.f32.mrf.mxu0 }
 0x1bc   :  { %v1937_v47 = vpop.f32.mrf.mxu1 }
 0x1f5   :  { %v1973_v49 = vpop.f32.mrf.mxu0 }
 0x1f6   :  { %v2014_v50 = vpop.f32.mrf.mxu1  ;;  %v1974_v52 = vadd.f32 %v1973_v49, %v1933_v43 }
 0x1f7   :  { %v1975_v53 = vpop.f32.mrf.mxu0 }
 0x1f8   :  { %v2016_v54 = vpop.f32.mrf.mxu1  ;;  %v2015_v55 = vadd.f32 %v2014_v50, %v1974_v52  ;;  %v1976_v56 = vadd.f32 %v1975_v53, %v1935_v51 }
 0x1f9   :  { %v1977_v57 = vpop.f32.mrf.mxu0 }
 0x1fa   :  { %v2018_v58 = vpop.f32.mrf.mxu1  ;;  %v2017_v59 = vadd.f32 %v2016_v54, %v1976_v56  ;;  %v2021_v60 = vmax.f32 %v2015_v55, 0.0 }
 0x1fb   :  { %v1978_v61 = vpop.f32.mrf.mxu0 }
 0x1fc   :  { %v2019_v62 = vpop.f32.mrf.mxu1  ;;  %v2022_v63 = vmax.f32 %v2017_v59, 0.0  ;;  %v2023_v1 = vpack.c.bf16 %v2021_v60, %v2021_v60 }
 0x1fe   :  { %v2024_v0 = vpack.c.bf16 %v2022_v63, %v2022_v63 }
 0x200   :  { %2261 = vmatprep.mubr.bf16.mxu0 %v2024_v0 }
 0x201   :  { %2262 = vmatmul.mubr.bf16.vlgmr.msra.gmra.mxu0 %v2023_v1 }
 0x2c1   :  { %v2263_v9 = vpop.f32.mrf.mxu0 }
 0x2c2   :  { %v2264_v10 = vadd.f32 %v2263_v9, %v2062_v7 }
 0x2c3   :  { %v2265_v11 = vpop.f32.mrf.mxu0 }
 0x2c4   :  { %v2266_v12 = vadd.f32 %v2265_v11, %v2066_v8  ;;  %v2270_v13 = vmax.f32 %v2264_v10, 0.0 }
 0x2c5   :  { %v2267_v14 = vpop.f32.mrf.mxu0 }
 0x2c6   :  { %v2271_v15 = vmax.f32 %v2266_v12, 0.0  ;;  %v2272_v22 = vpack.c.bf16 %v2270_v13, %v2270_v13 }
 0x2c7   :  { %v2268_v16 = vpop.f32.mrf.mxu0 }
 0x2c8   :  { %v2273_v17 = vpack.c.bf16 %v2271_v15, %v2271_v15 }
 0x2ca   :  { %2441 = vmatprep.mubr.bf16.mxu1 %v2273_v17 }
 0x2cb   :  { %2442 = vmatmul.mubr.bf16.vlgmr.msra.gmra.mxu1 %v2272_v22 }
 0x38b   :  { %v2805_v24 = vpop.f32.mrf.mxu1 }
 0x38d   :  { %v2806_v25 = vpop.f32.mrf.mxu1 }
 0x38e   :  { %v2807_v23 = vadd.f32 %v2806_v25, %v2805_v24 }
 0x38f   :  { %v2808_v18 = vpop.f32.mrf.mxu1 }
 0x390   :  { %v2444_v26 = vadd.f32 %v2807_v23, %v2772_v28 }
 0x391   :  { %v2809_v27 = vpop.f32.mrf.mxu1 }
 0x392   :  { %v2449_v29 = vpack.c.bf16 %v2444_v26, %v2444_v26 }
 0x394   :  { %2450 = vst [vmem:[#allocation10] sm:$0xf] %v2449_v29 }
 0x395   :  { %3375 = shalt.err (!%p3372_p10)
}
 0x396   :  { %2460 = dma.vmem_to_hbm [thread:$0]  %s2458_s26, 64, %s3526_s7, [#allocation4]  }
 0x397   :  { %3390 = dma.done.wait [#allocation4], 64  }
 0x398   :  { %3391 = vsyncadd [#allocation4], 4294967232 }
 0x399   :  { %2464 = vsyncpa [#allocation3], 1 }
 0x39a   :  { %2465 = vsyncpa [#allocation6], 1 }
 0x39b   :  { %2466 = vsyncpa [#allocation9], 1 }
 0x39c   :  { %2467 = vsyncpa [#allocation4], 1 }

</bundles_post_ra>
